<compile_context>
chip_gen: v5e
topology: v5e:2x2
jax: 0.10.0
libtpu: 0.0.40
codegen_flags: <defaults>
</compile_context>

<pallas_src>
import functools

import jax
import jax.numpy as jnp
from jax.experimental import pallas as pl
from jax.experimental.pallas import tpu as pltpu

# ---- small, module-consistent hyperparameters (torch used 384/8/64/8) ----
N_EMBD = 32
N_HEAD = 4
HEAD_SIZE = N_EMBD // N_HEAD
BLOCK_SIZE = 16
N_LAYER = 2
VOCAB_SIZE = 16
VOCAB_PAD = 128          # pad lm-head output dim to a full lane width
LN_EPS = 1e-5


# ---------------------------------------------------------------------------
# Fully fused GPT forward kernel: embedding -> N_LAYER blocks -> LN_f -> lm_head
# One grid step per batch half (v7x megacore); everything else lives in VMEM.
# ---------------------------------------------------------------------------
def _gpt_kernel(idx_ref, tok_ref, pos_ref,
                wqkv_ref, wproj_ref, w1_ref, w2_ref,
                vecs_ref, b1_ref, lnf_ref, hw_ref, hb_ref,
                o_ref, *, bp, t):
    C = N_EMBD
    HS = HEAD_SIZE
    m = bp * t

    # ---- token embedding (one-hot matmul: exact select, no XLA gather) + pos ----
    onehot = (idx_ref[...] ==
              jax.lax.broadcasted_iota(jnp.int32, (m, VOCAB_SIZE), 1)
              ).astype(jnp.float32)                                      # (m, V)
    x = jnp.dot(onehot, tok_ref[...], preferred_element_type=jnp.float32)  # (m, C)
    pos = pos_ref[...]                                                    # (t, C)
    if bp > 1:
        pos = jnp.concatenate([pos] * bp, axis=0)
    x = x + pos

    # ---- causal mask as additive bias, hoisted out of the layer/head loops ----
    row = jax.lax.broadcasted_iota(jnp.int32, (t, t), 0)
    col = jax.lax.broadcasted_iota(jnp.int32, (t, t), 1)
    mask_bias = jnp.where(col <= row, 0.0, -1e30)

    qk_dims = (((1,), (1,)), ((), ()))   # contract last dims: q @ k^T without a transpose

    # TODO(synk): at the real config (C=384, L=8) the stacked bf16 layer weights
    # (~28 MB) should be left in memory_space=pl.ANY and pipelined per layer
    # (emit_pipeline / layer grid axis), especially on v7x (64 MiB VMEM).
    for l in range(N_LAYER):
        vecs = vecs_ref[l]                               # (6, C) f32
        proj_b, ln1_g, ln1_b = vecs[0:1], vecs[1:2], vecs[2:3]
        b2, ln2_g, ln2_b = vecs[3:4], vecs[4:5], vecs[5:6]

        # fused QKV matmul over all rows (1/sqrt(hs) already folded into Q columns)
        qkv = jnp.dot(x.astype(jnp.bfloat16), wqkv_ref[l],
                      preferred_element_type=jnp.float32)  # (m, 3C)

        # per-(batch, head) causal attention.
        # TODO(synk): at the real config (H=8, hs=64) batch the head matmuls via a
        # 3-D dot_general to cut vreg pressure; at these toy sizes the static
        # unroll avoids the (T,H,hs)->(H,T,hs) XLU relayout it would need.
        att_rows = []
        for bi in range(bp):
            r0 = bi * t
            head_outs = []
            for h in range(N_HEAD):
                q = qkv[r0:r0 + t, h * HS:(h + 1) * HS].astype(jnp.bfloat16)
                k = qkv[r0:r0 + t, C + h * HS:C + (h + 1) * HS].astype(jnp.bfloat16)
                v = qkv[r0:r0 + t, 2 * C + h * HS:2 * C + (h + 1) * HS].astype(jnp.bfloat16)
                s = jax.lax.dot_general(q, k, qk_dims,
                                        preferred_element_type=jnp.float32)  # (t, t)
                s = s + mask_bias
                s = s - jnp.max(s, axis=-1, keepdims=True)
                p = jnp.exp(s)
                # reciprocal on the EUP slot instead of a VALU divide
                p = p * pl.reciprocal(jnp.sum(p, axis=-1, keepdims=True), approx=True)
                head_outs.append(jnp.dot(p.astype(jnp.bfloat16), v,
                                         preferred_element_type=jnp.float32))
            att_rows.append(jnp.concatenate(head_outs, axis=-1))            # (t, C)
        att = att_rows[0] if bp == 1 else jnp.concatenate(att_rows, axis=0)  # (m, C)

        # ---- output projection (+bias), residual, LayerNorm 1 (post-norm) ----
        sa = jnp.dot(att.astype(jnp.bfloat16), wproj_ref[l],
                     preferred_element_type=jnp.float32) + proj_b
        z = x + sa
        mean = jnp.mean(z, axis=-1, keepdims=True)
        var = jnp.mean((z - mean) ** 2, axis=-1, keepdims=True)
        x1 = (z - mean) * jax.lax.rsqrt(var + LN_EPS) * ln1_g + ln1_b

        # ---- FeedForward: ReLU(x1 @ W1 + b1) @ W2 + b2 ----
        hdd = jnp.dot(x1.astype(jnp.bfloat16), w1_ref[l],
                      preferred_element_type=jnp.float32) + b1_ref[l]
        hdd = jnp.maximum(hdd, 0.0)
        ff = jnp.dot(hdd.astype(jnp.bfloat16), w2_ref[l],
                     preferred_element_type=jnp.float32) + b2

        # ---- residual, LayerNorm 2 ----
        z2 = x1 + ff
        mean2 = jnp.mean(z2, axis=-1, keepdims=True)
        var2 = jnp.mean((z2 - mean2) ** 2, axis=-1, keepdims=True)
        x = (z2 - mean2) * jax.lax.rsqrt(var2 + LN_EPS) * ln2_g + ln2_b

    # ---- final LayerNorm + lm_head (lane-dense 128-wide padded logits store) ----
    lnf = lnf_ref[...]
    mean = jnp.mean(x, axis=-1, keepdims=True)
    var = jnp.mean((x - mean) ** 2, axis=-1, keepdims=True)
    xn = (x - mean) * jax.lax.rsqrt(var + LN_EPS) * lnf[0:1] + lnf[1:2]
    logits = jnp.dot(xn.astype(jnp.bfloat16), hw_ref[...],
                     preferred_element_type=jnp.float32) + hb_ref[...]
    o_ref[...] = logits.astype(o_ref.dtype)


# ---------------------------------------------------------------------------
# Parameter construction (weights pre-transposed to (in, out), stored bf16;
# biases / LayerNorm params f32; per-layer params stacked on a leading L axis).
# ---------------------------------------------------------------------------
def init_params(key):
    C = N_EMBD

    def normal(k, shape, std=0.02):
        return std * jax.random.normal(k, shape, dtype=jnp.float32)

    keys = iter(jax.random.split(key, 3 + N_LAYER * 4))

    head_w = jnp.zeros((C, VOCAB_PAD), jnp.float32)
    head_w = head_w.at[:, :VOCAB_SIZE].set(normal(next(keys), (C, VOCAB_SIZE)))

    scale = HEAD_SIZE ** -0.5
    wqkv_l, wproj_l, w1_l, w2_l, vecs_l, b1_l = [], [], [], [], [], []
    for _ in range(N_LAYER):
        wqkv = normal(next(keys), (C, 3 * C))
        wqkv = wqkv.at[:, :C].multiply(scale)   # fold 1/sqrt(head_size) into Q columns
        wqkv_l.append(wqkv)
        wproj_l.append(normal(next(keys), (C, C)))
        w1_l.append(normal(next(keys), (C, 4 * C)))
        w2_l.append(normal(next(keys), (4 * C, C)))
        vecs_l.append(jnp.stack([
            jnp.zeros((C,), jnp.float32),   # proj_b
            jnp.ones((C,), jnp.float32),    # ln1_gamma
            jnp.zeros((C,), jnp.float32),   # ln1_beta
            jnp.zeros((C,), jnp.float32),   # b2
            jnp.ones((C,), jnp.float32),    # ln2_gamma
            jnp.zeros((C,), jnp.float32),   # ln2_beta
        ]))
        b1_l.append(jnp.zeros((1, 4 * C), jnp.float32))

    return {
        "tok_emb": normal(next(keys), (VOCAB_SIZE, C), std=1.0),     # f32 (exact lookup)
        "pos_emb": normal(next(keys), (BLOCK_SIZE, C), std=1.0),
        "w_qkv": jnp.stack(wqkv_l).astype(jnp.bfloat16),             # (L, C, 3C)
        "proj_w": jnp.stack(wproj_l).astype(jnp.bfloat16),           # (L, C, C)
        "w1": jnp.stack(w1_l).astype(jnp.bfloat16),                  # (L, C, 4C)
        "w2": jnp.stack(w2_l).astype(jnp.bfloat16),                  # (L, 4C, C)
        "vecs": jnp.stack(vecs_l),                                   # (L, 6, C) f32
        "b1": jnp.stack(b1_l),                                       # (L, 1, 4C) f32
        "lnf": jnp.stack([jnp.ones((C,), jnp.float32),
                          jnp.zeros((C,), jnp.float32)]),            # (2, C)
        "head_w": head_w.astype(jnp.bfloat16),                       # (C, VOCAB_PAD)
        "head_b": jnp.zeros((1, VOCAB_PAD), jnp.float32),
    }


# ---------------------------------------------------------------------------
# Forward pass (mirrors GPTLanguageModel.forward with targets=None)
# ---------------------------------------------------------------------------
def gpt_forward(params, index):
    B, T = index.shape
    C = N_EMBD
    # Split the batch in halves purely so v7x's two TensorCores each get a grid
    # step; on v5e/v6e (1 TC) this is just two sequential full-model steps.
    b2 = 2 if (B % 2 == 0 and B >= 2) else 1
    bp = B // b2

    idx_col = index.reshape(B * T, 1).astype(jnp.int32)
    pos = params["pos_emb"][:T]

    full = lambda nd: (lambda g: (0,) * nd)

    logits_pad = pl.pallas_call(
        functools.partial(_gpt_kernel, bp=bp, t=T),
        out_shape=jax.ShapeDtypeStruct((B * T, VOCAB_PAD), jnp.float32),
        grid=(b2,),
        in_specs=[
            pl.BlockSpec((bp * T, 1), lambda g: (g, 0)),             # token ids
            pl.BlockSpec((VOCAB_SIZE, C), full(2)),                  # tok_emb
            pl.BlockSpec((T, C), full(2)),                           # pos_emb[:T]
            pl.BlockSpec((N_LAYER, C, 3 * C), full(3)),              # w_qkv (stacked)
            pl.BlockSpec((N_LAYER, C, C), full(3)),                  # proj_w
            pl.BlockSpec((N_LAYER, C, 4 * C), full(3)),              # w1
            pl.BlockSpec((N_LAYER, 4 * C, C), full(3)),              # w2
            pl.BlockSpec((N_LAYER, 6, C), full(3)),                  # packed (1,C) vectors
            pl.BlockSpec((N_LAYER, 1, 4 * C), full(3)),              # b1
            pl.BlockSpec((2, C), full(2)),                           # lnf gamma/beta
            pl.BlockSpec((C, VOCAB_PAD), full(2)),                   # head_w (lane-padded)
            pl.BlockSpec((1, VOCAB_PAD), full(2)),                   # head_b
        ],
        out_specs=pl.BlockSpec((bp * T, VOCAB_PAD), lambda g: (g, 0)),
        compiler_params=pltpu.CompilerParams(
            dimension_semantics=("parallel",),
            vmem_limit_bytes=32 * 1024 * 1024),
    )(idx_col, params["tok_emb"], pos,
      params["w_qkv"], params["proj_w"], params["w1"], params["w2"],
      params["vecs"], params["b1"], params["lnf"],
      params["head_w"], params["head_b"])

    logits = logits_pad[:, :VOCAB_SIZE].reshape(B, T, VOCAB_SIZE)
    loss = None  # targets is None -> no cross-entropy loss
    # TODO(synk): training-mode dropout and the targets!=None cross-entropy path
    # are not implemented (forward here matches eval/inference semantics).
    return logits, loss


if __name__ == "__main__":
    key = jax.random.PRNGKey(0)
    pkey, ikey = jax.random.split(key)

    params = init_params(pkey)

    B, T = 2, 8
    index = jax.random.randint(ikey, (B, T), minval=0, maxval=VOCAB_SIZE,
                               dtype=jnp.int32)

    logits, loss = jax.jit(functools.partial(gpt_forward, params))(index)
    logits = jax.block_until_ready(logits)

    assert logits.shape == (B, T, VOCAB_SIZE), logits.shape
    assert logits.dtype == jnp.float32
    assert loss is None
    assert bool(jnp.all(jnp.isfinite(logits)))
    print("KERNEL_OK")
</pallas_src>

<mosaic_0001>
module attributes {stable_mosaic.version = 11 : i64} {
  func.func @_gpt_kernel(%arg0: i32, %arg1: memref<8x1xi32, #tpu.memory_space<vmem>>, %arg2: memref<16x32xf32, #tpu.memory_space<vmem>>, %arg3: memref<8x32xf32, #tpu.memory_space<vmem>>, %arg4: memref<2x32x96xbf16, #tpu.memory_space<vmem>>, %arg5: memref<2x32x32xbf16, #tpu.memory_space<vmem>>, %arg6: memref<2x32x128xbf16, #tpu.memory_space<vmem>>, %arg7: memref<2x128x32xbf16, #tpu.memory_space<vmem>>, %arg8: memref<2x6x32xf32, #tpu.memory_space<vmem>>, %arg9: memref<2x1x128xf32, #tpu.memory_space<vmem>>, %arg10: memref<2x32xf32, #tpu.memory_space<vmem>>, %arg11: memref<32x128xbf16, #tpu.memory_space<vmem>>, %arg12: memref<1x128xf32, #tpu.memory_space<vmem>>, %arg13: memref<8x128xf32, #tpu.memory_space<vmem>>) attributes {dimension_semantics = [#tpu.dimension_semantics<parallel>], iteration_bounds = array<i64: 2>, scalar_prefetch = 0 : i64, scratch_operands = 0 : i64, tpu.core_type = #tpu.core_type<tc>, window_params = [{transform_indices = @transform_0, window_bounds = array<i64: 8, 1>}, {pipeline_mode = #tpu.pipeline_mode<synchronous>, transform_indices = @transform_1, window_bounds = array<i64: 16, 32>}, {pipeline_mode = #tpu.pipeline_mode<synchronous>, transform_indices = @transform_2, window_bounds = array<i64: 8, 32>}, {pipeline_mode = #tpu.pipeline_mode<synchronous>, transform_indices = @transform_3, window_bounds = array<i64: 2, 32, 96>}, {pipeline_mode = #tpu.pipeline_mode<synchronous>, transform_indices = @transform_4, window_bounds = array<i64: 2, 32, 32>}, {pipeline_mode = #tpu.pipeline_mode<synchronous>, transform_indices = @transform_5, window_bounds = array<i64: 2, 32, 128>}, {pipeline_mode = #tpu.pipeline_mode<synchronous>, transform_indices = @transform_6, window_bounds = array<i64: 2, 128, 32>}, {pipeline_mode = #tpu.pipeline_mode<synchronous>, transform_indices = @transform_7, window_bounds = array<i64: 2, 6, 32>}, {pipeline_mode = #tpu.pipeline_mode<synchronous>, transform_indices = @transform_8, window_bounds = array<i64: 2, 1, 128>}, {pipeline_mode = #tpu.pipeline_mode<synchronous>, transform_indices = @transform_9, window_bounds = array<i64: 2, 32>}, {pipeline_mode = #tpu.pipeline_mode<synchronous>, transform_indices = @transform_10, window_bounds = array<i64: 32, 128>}, {pipeline_mode = #tpu.pipeline_mode<synchronous>, transform_indices = @transform_11, window_bounds = array<i64: 1, 128>}, {transform_indices = @transform_12, window_bounds = array<i64: 8, 128>}]} {
    %c0 = arith.constant 0 : index
    %c0_0 = arith.constant 0 : index
    %0 = vector.load %arg1[%c0, %c0_0] : memref<8x1xi32, #tpu.memory_space<vmem>>, vector<8x1xi32>
    %1 = tpu.iota {dimensions = array<i32: 1>} : vector<8x16xi32>
    %2 = vector.broadcast %0 : vector<8x1xi32> to vector<8x16xi32>
    %3 = arith.cmpi eq, %2, %1 : vector<8x16xi32>
    %4 = arith.extui %3 : vector<8x16xi1> to vector<8x16xi32>
    %5 = arith.sitofp %4 : vector<8x16xi32> to vector<8x16xf32>
    %c0_1 = arith.constant 0 : index
    %c0_2 = arith.constant 0 : index
    %6 = vector.load %arg2[%c0_1, %c0_2] : memref<16x32xf32, #tpu.memory_space<vmem>>, vector<16x32xf32>
    %cst = arith.constant dense<0.000000e+00> : vector<8x32xf32>
    %7 = tpu.matmul %5, %6, %cst {dimension_numbers = #tpu.dot_dimension_numbers<[1], [0], [0], [1], [0, 0, 1, 1], [], []>} : vector<8x16xf32>, vector<16x32xf32>, vector<8x32xf32> -> vector<8x32xf32>
    %c0_3 = arith.constant 0 : index
    %c0_4 = arith.constant 0 : index
    %8 = vector.load %arg3[%c0_3, %c0_4] : memref<8x32xf32, #tpu.memory_space<vmem>>, vector<8x32xf32>
    %9 = arith.addf %7, %8 : vector<8x32xf32>
    %10 = tpu.iota {dimensions = array<i32: 0>} : vector<8x8xi32>
    %11 = tpu.iota {dimensions = array<i32: 1>} : vector<8x8xi32>
    %12 = arith.cmpi sle, %11, %10 : vector<8x8xi32>
    %cst_5 = arith.constant 0.000000e+00 : f32
    %cst_6 = arith.constant -1.000000e+30 : f32
    %13 = vector.broadcast %cst_5 : f32 to vector<8x8xf32>
    %14 = vector.broadcast %cst_6 : f32 to vector<8x8xf32>
    %15 = arith.select %12, %13, %14 : vector<8x8xi1>, vector<8x8xf32>
    %c0_7 = arith.constant 0 : index
    %c0_8 = arith.constant 0 : index
    %c0_9 = arith.constant 0 : index
    %16 = vector.load %arg8[%c0_7, %c0_8, %c0_9] : memref<2x6x32xf32, #tpu.memory_space<vmem>>, vector<1x6x32xf32>
    %17 = vector.shape_cast %16 : vector<1x6x32xf32> to vector<6x32xf32>
    %18 = vector.extract_strided_slice %17 {offsets = [0, 0], sizes = [1, 32], strides = [1, 1]} : vector<6x32xf32> to vector<1x32xf32>
    %19 = vector.extract_strided_slice %17 {offsets = [1, 0], sizes = [1, 32], strides = [1, 1]} : vector<6x32xf32> to vector<1x32xf32>
    %20 = vector.extract_strided_slice %17 {offsets = [2, 0], sizes = [1, 32], strides = [1, 1]} : vector<6x32xf32> to vector<1x32xf32>
    %21 = vector.extract_strided_slice %17 {offsets = [3, 0], sizes = [1, 32], strides = [1, 1]} : vector<6x32xf32> to vector<1x32xf32>
    %22 = vector.extract_strided_slice %17 {offsets = [4, 0], sizes = [1, 32], strides = [1, 1]} : vector<6x32xf32> to vector<1x32xf32>
    %23 = vector.extract_strided_slice %17 {offsets = [5, 0], sizes = [1, 32], strides = [1, 1]} : vector<6x32xf32> to vector<1x32xf32>
    %24 = arith.truncf %9 : vector<8x32xf32> to vector<8x32xbf16>
    %c0_10 = arith.constant 0 : index
    %c0_11 = arith.constant 0 : index
    %c0_12 = arith.constant 0 : index
    %25 = vector.load %arg4[%c0_10, %c0_11, %c0_12] : memref<2x32x96xbf16, #tpu.memory_space<vmem>>, vector<1x32x96xbf16>
    %26 = vector.shape_cast %25 : vector<1x32x96xbf16> to vector<32x96xbf16>
    %cst_13 = arith.constant dense<0.000000e+00> : vector<8x96xf32>
    %27 = tpu.matmul %24, %26, %cst_13 {dimension_numbers = #tpu.dot_dimension_numbers<[1], [0], [0], [1], [0, 0, 1, 1], [], []>} : vector<8x32xbf16>, vector<32x96xbf16>, vector<8x96xf32> -> vector<8x96xf32>
    %28 = vector.extract_strided_slice %27 {offsets = [0, 0], sizes = [8, 8], strides = [1, 1]} : vector<8x96xf32> to vector<8x8xf32>
    %29 = arith.truncf %28 : vector<8x8xf32> to vector<8x8xbf16>
    %30 = vector.extract_strided_slice %27 {offsets = [0, 32], sizes = [8, 8], strides = [1, 1]} : vector<8x96xf32> to vector<8x8xf32>
    %31 = arith.truncf %30 : vector<8x8xf32> to vector<8x8xbf16>
    %32 = vector.extract_strided_slice %27 {offsets = [0, 64], sizes = [8, 8], strides = [1, 1]} : vector<8x96xf32> to vector<8x8xf32>
    %33 = arith.truncf %32 : vector<8x8xf32> to vector<8x8xbf16>
    %cst_14 = arith.constant dense<0.000000e+00> : vector<8x8xf32>
    %34 = tpu.matmul %29, %31, %cst_14 {dimension_numbers = #tpu.dot_dimension_numbers<[1], [1], [0], [0], [0, 0, 1, 0], [], []>} : vector<8x8xbf16>, vector<8x8xbf16>, vector<8x8xf32> -> vector<8x8xf32>
    %35 = arith.addf %34, %15 : vector<8x8xf32>
    %cst_15 = arith.constant dense<0xFF800000> : vector<8xf32>
    %36 = vector.multi_reduction <maximumf>, %35, %cst_15 [1] : vector<8x8xf32> to vector<8xf32>
    %37 = vector.shape_cast %36 : vector<8xf32> to vector<8x1xf32>
    %38 = vector.broadcast %37 : vector<8x1xf32> to vector<8x8xf32>
    %39 = arith.subf %35, %38 : vector<8x8xf32>
    %40 = math.exp %39 : vector<8x8xf32>
    %cst_16 = arith.constant dense<0.000000e+00> : vector<8xf32>
    %41 = vector.multi_reduction <add>, %40, %cst_16 [1] : vector<8x8xf32> to vector<8xf32>
    %42 = vector.shape_cast %41 : vector<8xf32> to vector<8x1xf32>
    %43 = tpu.reciprocal %42 {approx = true} : vector<8x1xf32> -> vector<8x1xf32>
    %44 = vector.broadcast %43 : vector<8x1xf32> to vector<8x8xf32>
    %45 = arith.mulf %40, %44 : vector<8x8xf32>
    %46 = arith.truncf %45 : vector<8x8xf32> to vector<8x8xbf16>
    %cst_17 = arith.constant dense<0.000000e+00> : vector<8x8xf32>
    %47 = tpu.matmul %46, %33, %cst_17 {dimension_numbers = #tpu.dot_dimension_numbers<[1], [0], [0], [1], [0, 0, 1, 1], [], []>} : vector<8x8xbf16>, vector<8x8xbf16>, vector<8x8xf32> -> vector<8x8xf32>
    %48 = vector.extract_strided_slice %27 {offsets = [0, 8], sizes = [8, 8], strides = [1, 1]} : vector<8x96xf32> to vector<8x8xf32>
    %49 = arith.truncf %48 : vector<8x8xf32> to vector<8x8xbf16>
    %50 = vector.extract_strided_slice %27 {offsets = [0, 40], sizes = [8, 8], strides = [1, 1]} : vector<8x96xf32> to vector<8x8xf32>
    %51 = arith.truncf %50 : vector<8x8xf32> to vector<8x8xbf16>
    %52 = vector.extract_strided_slice %27 {offsets = [0, 72], sizes = [8, 8], strides = [1, 1]} : vector<8x96xf32> to vector<8x8xf32>
    %53 = arith.truncf %52 : vector<8x8xf32> to vector<8x8xbf16>
    %cst_18 = arith.constant dense<0.000000e+00> : vector<8x8xf32>
    %54 = tpu.matmul %49, %51, %cst_18 {dimension_numbers = #tpu.dot_dimension_numbers<[1], [1], [0], [0], [0, 0, 1, 0], [], []>} : vector<8x8xbf16>, vector<8x8xbf16>, vector<8x8xf32> -> vector<8x8xf32>
    %55 = arith.addf %54, %15 : vector<8x8xf32>
    %cst_19 = arith.constant dense<0xFF800000> : vector<8xf32>
    %56 = vector.multi_reduction <maximumf>, %55, %cst_19 [1] : vector<8x8xf32> to vector<8xf32>
    %57 = vector.shape_cast %56 : vector<8xf32> to vector<8x1xf32>
    %58 = vector.broadcast %57 : vector<8x1xf32> to vector<8x8xf32>
    %59 = arith.subf %55, %58 : vector<8x8xf32>
    %60 = math.exp %59 : vector<8x8xf32>
    %cst_20 = arith.constant dense<0.000000e+00> : vector<8xf32>
    %61 = vector.multi_reduction <add>, %60, %cst_20 [1] : vector<8x8xf32> to vector<8xf32>
    %62 = vector.shape_cast %61 : vector<8xf32> to vector<8x1xf32>
    %63 = tpu.reciprocal %62 {approx = true} : vector<8x1xf32> -> vector<8x1xf32>
    %64 = vector.broadcast %63 : vector<8x1xf32> to vector<8x8xf32>
    %65 = arith.mulf %60, %64 : vector<8x8xf32>
    %66 = arith.truncf %65 : vector<8x8xf32> to vector<8x8xbf16>
    %cst_21 = arith.constant dense<0.000000e+00> : vector<8x8xf32>
    %67 = tpu.matmul %66, %53, %cst_21 {dimension_numbers = #tpu.dot_dimension_numbers<[1], [0], [0], [1], [0, 0, 1, 1], [], []>} : vector<8x8xbf16>, vector<8x8xbf16>, vector<8x8xf32> -> vector<8x8xf32>
    %68 = vector.extract_strided_slice %27 {offsets = [0, 16], sizes = [8, 8], strides = [1, 1]} : vector<8x96xf32> to vector<8x8xf32>
    %69 = arith.truncf %68 : vector<8x8xf32> to vector<8x8xbf16>
    %70 = vector.extract_strided_slice %27 {offsets = [0, 48], sizes = [8, 8], strides = [1, 1]} : vector<8x96xf32> to vector<8x8xf32>
    %71 = arith.truncf %70 : vector<8x8xf32> to vector<8x8xbf16>
    %72 = vector.extract_strided_slice %27 {offsets = [0, 80], sizes = [8, 8], strides = [1, 1]} : vector<8x96xf32> to vector<8x8xf32>
    %73 = arith.truncf %72 : vector<8x8xf32> to vector<8x8xbf16>
    %cst_22 = arith.constant dense<0.000000e+00> : vector<8x8xf32>
    %74 = tpu.matmul %69, %71, %cst_22 {dimension_numbers = #tpu.dot_dimension_numbers<[1], [1], [0], [0], [0, 0, 1, 0], [], []>} : vector<8x8xbf16>, vector<8x8xbf16>, vector<8x8xf32> -> vector<8x8xf32>
    %75 = arith.addf %74, %15 : vector<8x8xf32>
    %cst_23 = arith.constant dense<0xFF800000> : vector<8xf32>
    %76 = vector.multi_reduction <maximumf>, %75, %cst_23 [1] : vector<8x8xf32> to vector<8xf32>
    %77 = vector.shape_cast %76 : vector<8xf32> to vector<8x1xf32>
    %78 = vector.broadcast %77 : vector<8x1xf32> to vector<8x8xf32>
    %79 = arith.subf %75, %78 : vector<8x8xf32>
    %80 = math.exp %79 : vector<8x8xf32>
    %cst_24 = arith.constant dense<0.000000e+00> : vector<8xf32>
    %81 = vector.multi_reduction <add>, %80, %cst_24 [1] : vector<8x8xf32> to vector<8xf32>
    %82 = vector.shape_cast %81 : vector<8xf32> to vector<8x1xf32>
    %83 = tpu.reciprocal %82 {approx = true} : vector<8x1xf32> -> vector<8x1xf32>
    %84 = vector.broadcast %83 : vector<8x1xf32> to vector<8x8xf32>
    %85 = arith.mulf %80, %84 : vector<8x8xf32>
    %86 = arith.truncf %85 : vector<8x8xf32> to vector<8x8xbf16>
    %cst_25 = arith.constant dense<0.000000e+00> : vector<8x8xf32>
    %87 = tpu.matmul %86, %73, %cst_25 {dimension_numbers = #tpu.dot_dimension_numbers<[1], [0], [0], [1], [0, 0, 1, 1], [], []>} : vector<8x8xbf16>, vector<8x8xbf16>, vector<8x8xf32> -> vector<8x8xf32>
    %88 = vector.extract_strided_slice %27 {offsets = [0, 24], sizes = [8, 8], strides = [1, 1]} : vector<8x96xf32> to vector<8x8xf32>
    %89 = arith.truncf %88 : vector<8x8xf32> to vector<8x8xbf16>
    %90 = vector.extract_strided_slice %27 {offsets = [0, 56], sizes = [8, 8], strides = [1, 1]} : vector<8x96xf32> to vector<8x8xf32>
    %91 = arith.truncf %90 : vector<8x8xf32> to vector<8x8xbf16>
    %92 = vector.extract_strided_slice %27 {offsets = [0, 88], sizes = [8, 8], strides = [1, 1]} : vector<8x96xf32> to vector<8x8xf32>
    %93 = arith.truncf %92 : vector<8x8xf32> to vector<8x8xbf16>
    %cst_26 = arith.constant dense<0.000000e+00> : vector<8x8xf32>
    %94 = tpu.matmul %89, %91, %cst_26 {dimension_numbers = #tpu.dot_dimension_numbers<[1], [1], [0], [0], [0, 0, 1, 0], [], []>} : vector<8x8xbf16>, vector<8x8xbf16>, vector<8x8xf32> -> vector<8x8xf32>
    %95 = arith.addf %94, %15 : vector<8x8xf32>
    %cst_27 = arith.constant dense<0xFF800000> : vector<8xf32>
    %96 = vector.multi_reduction <maximumf>, %95, %cst_27 [1] : vector<8x8xf32> to vector<8xf32>
    %97 = vector.shape_cast %96 : vector<8xf32> to vector<8x1xf32>
    %98 = vector.broadcast %97 : vector<8x1xf32> to vector<8x8xf32>
    %99 = arith.subf %95, %98 : vector<8x8xf32>
    %100 = math.exp %99 : vector<8x8xf32>
    %cst_28 = arith.constant dense<0.000000e+00> : vector<8xf32>
    %101 = vector.multi_reduction <add>, %100, %cst_28 [1] : vector<8x8xf32> to vector<8xf32>
    %102 = vector.shape_cast %101 : vector<8xf32> to vector<8x1xf32>
    %103 = tpu.reciprocal %102 {approx = true} : vector<8x1xf32> -> vector<8x1xf32>
    %104 = vector.broadcast %103 : vector<8x1xf32> to vector<8x8xf32>
    %105 = arith.mulf %100, %104 : vector<8x8xf32>
    %106 = arith.truncf %105 : vector<8x8xf32> to vector<8x8xbf16>
    %cst_29 = arith.constant dense<0.000000e+00> : vector<8x8xf32>
    %107 = tpu.matmul %106, %93, %cst_29 {dimension_numbers = #tpu.dot_dimension_numbers<[1], [0], [0], [1], [0, 0, 1, 1], [], []>} : vector<8x8xbf16>, vector<8x8xbf16>, vector<8x8xf32> -> vector<8x8xf32>
    %108 = tpu.concatenate %47, %67, %87, %107 in 1 : vector<8x8xf32>, vector<8x8xf32>, vector<8x8xf32>, vector<8x8xf32> -> vector<8x32xf32>
    %109 = arith.truncf %108 : vector<8x32xf32> to vector<8x32xbf16>
    %c0_30 = arith.constant 0 : index
    %c0_31 = arith.constant 0 : index
    %c0_32 = arith.constant 0 : index
    %110 = vector.load %arg5[%c0_30, %c0_31, %c0_32] : memref<2x32x32xbf16, #tpu.memory_space<vmem>>, vector<1x32x32xbf16>
    %111 = vector.shape_cast %110 : vector<1x32x32xbf16> to vector<32x32xbf16>
    %cst_33 = arith.constant dense<0.000000e+00> : vector<8x32xf32>
    %112 = tpu.matmul %109, %111, %cst_33 {dimension_numbers = #tpu.dot_dimension_numbers<[1], [0], [0], [1], [0, 0, 1, 1], [], []>} : vector<8x32xbf16>, vector<32x32xbf16>, vector<8x32xf32> -> vector<8x32xf32>
    %113 = vector.broadcast %18 : vector<1x32xf32> to vector<8x32xf32>
    %114 = arith.addf %112, %113 : vector<8x32xf32>
    %115 = arith.addf %9, %114 : vector<8x32xf32>
    %cst_34 = arith.constant dense<0.000000e+00> : vector<8xf32>
    %116 = vector.multi_reduction <add>, %115, %cst_34 [1] : vector<8x32xf32> to vector<8xf32>
    %117 = vector.shape_cast %116 : vector<8xf32> to vector<8x1xf32>
    %cst_35 = arith.constant 3.200000e+01 : f32
    %118 = vector.broadcast %cst_35 : f32 to vector<8x1xf32>
    %119 = arith.divf %117, %118 : vector<8x1xf32>
    %120 = vector.broadcast %119 : vector<8x1xf32> to vector<8x32xf32>
    %121 = arith.subf %115, %120 : vector<8x32xf32>
    %122 = arith.mulf %121, %121 : vector<8x32xf32>
    %cst_36 = arith.constant dense<0.000000e+00> : vector<8xf32>
    %123 = vector.multi_reduction <add>, %122, %cst_36 [1] : vector<8x32xf32> to vector<8xf32>
    %124 = vector.shape_cast %123 : vector<8xf32> to vector<8x1xf32>
    %cst_37 = arith.constant 3.200000e+01 : f32
    %125 = vector.broadcast %cst_37 : f32 to vector<8x1xf32>
    %126 = arith.divf %124, %125 : vector<8x1xf32>
    %127 = vector.broadcast %119 : vector<8x1xf32> to vector<8x32xf32>
    %128 = arith.subf %115, %127 : vector<8x32xf32>
    %cst_38 = arith.constant 9.99999974E-6 : f32
    %129 = vector.broadcast %cst_38 : f32 to vector<8x1xf32>
    %130 = arith.addf %126, %129 : vector<8x1xf32>
    %131 = math.rsqrt %130 : vector<8x1xf32>
    %132 = vector.broadcast %131 : vector<8x1xf32> to vector<8x32xf32>
    %133 = arith.mulf %128, %132 : vector<8x32xf32>
    %134 = vector.broadcast %19 : vector<1x32xf32> to vector<8x32xf32>
    %135 = arith.mulf %133, %134 : vector<8x32xf32>
    %136 = vector.broadcast %20 : vector<1x32xf32> to vector<8x32xf32>
    %137 = arith.addf %135, %136 : vector<8x32xf32>
    %138 = arith.truncf %137 : vector<8x32xf32> to vector<8x32xbf16>
    %c0_39 = arith.constant 0 : index
    %c0_40 = arith.constant 0 : index
    %c0_41 = arith.constant 0 : index
    %139 = vector.load %arg6[%c0_39, %c0_40, %c0_41] : memref<2x32x128xbf16, #tpu.memory_space<vmem>>, vector<1x32x128xbf16>
    %140 = vector.shape_cast %139 : vector<1x32x128xbf16> to vector<32x128xbf16>
    %cst_42 = arith.constant dense<0.000000e+00> : vector<8x128xf32>
    %141 = tpu.matmul %138, %140, %cst_42 {dimension_numbers = #tpu.dot_dimension_numbers<[1], [0], [0], [1], [0, 0, 1, 1], [], []>} : vector<8x32xbf16>, vector<32x128xbf16>, vector<8x128xf32> -> vector<8x128xf32>
    %c0_43 = arith.constant 0 : index
    %c0_44 = arith.constant 0 : index
    %c0_45 = arith.constant 0 : index
    %142 = vector.load %arg9[%c0_43, %c0_44, %c0_45] : memref<2x1x128xf32, #tpu.memory_space<vmem>>, vector<1x1x128xf32>
    %143 = vector.shape_cast %142 : vector<1x1x128xf32> to vector<1x128xf32>
    %144 = vector.broadcast %143 : vector<1x128xf32> to vector<8x128xf32>
    %145 = arith.addf %141, %144 : vector<8x128xf32>
    %cst_46 = arith.constant 0.000000e+00 : f32
    %146 = vector.broadcast %cst_46 : f32 to vector<8x128xf32>
    %147 = arith.maximumf %145, %146 : vector<8x128xf32>
    %148 = arith.truncf %147 : vector<8x128xf32> to vector<8x128xbf16>
    %c0_47 = arith.constant 0 : index
    %c0_48 = arith.constant 0 : index
    %c0_49 = arith.constant 0 : index
    %149 = vector.load %arg7[%c0_47, %c0_48, %c0_49] : memref<2x128x32xbf16, #tpu.memory_space<vmem>>, vector<1x128x32xbf16>
    %150 = vector.shape_cast %149 : vector<1x128x32xbf16> to vector<128x32xbf16>
    %cst_50 = arith.constant dense<0.000000e+00> : vector<8x32xf32>
    %151 = tpu.matmul %148, %150, %cst_50 {dimension_numbers = #tpu.dot_dimension_numbers<[1], [0], [0], [1], [0, 0, 1, 1], [], []>} : vector<8x128xbf16>, vector<128x32xbf16>, vector<8x32xf32> -> vector<8x32xf32>
    %152 = vector.broadcast %21 : vector<1x32xf32> to vector<8x32xf32>
    %153 = arith.addf %151, %152 : vector<8x32xf32>
    %154 = arith.addf %137, %153 : vector<8x32xf32>
    %cst_51 = arith.constant dense<0.000000e+00> : vector<8xf32>
    %155 = vector.multi_reduction <add>, %154, %cst_51 [1] : vector<8x32xf32> to vector<8xf32>
    %156 = vector.shape_cast %155 : vector<8xf32> to vector<8x1xf32>
    %cst_52 = arith.constant 3.200000e+01 : f32
    %157 = vector.broadcast %cst_52 : f32 to vector<8x1xf32>
    %158 = arith.divf %156, %157 : vector<8x1xf32>
    %159 = vector.broadcast %158 : vector<8x1xf32> to vector<8x32xf32>
    %160 = arith.subf %154, %159 : vector<8x32xf32>
    %161 = arith.mulf %160, %160 : vector<8x32xf32>
    %cst_53 = arith.constant dense<0.000000e+00> : vector<8xf32>
    %162 = vector.multi_reduction <add>, %161, %cst_53 [1] : vector<8x32xf32> to vector<8xf32>
    %163 = vector.shape_cast %162 : vector<8xf32> to vector<8x1xf32>
    %cst_54 = arith.constant 3.200000e+01 : f32
    %164 = vector.broadcast %cst_54 : f32 to vector<8x1xf32>
    %165 = arith.divf %163, %164 : vector<8x1xf32>
    %166 = vector.broadcast %158 : vector<8x1xf32> to vector<8x32xf32>
    %167 = arith.subf %154, %166 : vector<8x32xf32>
    %cst_55 = arith.constant 9.99999974E-6 : f32
    %168 = vector.broadcast %cst_55 : f32 to vector<8x1xf32>
    %169 = arith.addf %165, %168 : vector<8x1xf32>
    %170 = math.rsqrt %169 : vector<8x1xf32>
    %171 = vector.broadcast %170 : vector<8x1xf32> to vector<8x32xf32>
    %172 = arith.mulf %167, %171 : vector<8x32xf32>
    %173 = vector.broadcast %22 : vector<1x32xf32> to vector<8x32xf32>
    %174 = arith.mulf %172, %173 : vector<8x32xf32>
    %175 = vector.broadcast %23 : vector<1x32xf32> to vector<8x32xf32>
    %176 = arith.addf %174, %175 : vector<8x32xf32>
    %c1 = arith.constant 1 : index
    %c0_56 = arith.constant 0 : index
    %c0_57 = arith.constant 0 : index
    %177 = vector.load %arg8[%c1, %c0_56, %c0_57] : memref<2x6x32xf32, #tpu.memory_space<vmem>>, vector<1x6x32xf32>
    %178 = vector.shape_cast %177 : vector<1x6x32xf32> to vector<6x32xf32>
    %179 = vector.extract_strided_slice %178 {offsets = [0, 0], sizes = [1, 32], strides = [1, 1]} : vector<6x32xf32> to vector<1x32xf32>
    %180 = vector.extract_strided_slice %178 {offsets = [1, 0], sizes = [1, 32], strides = [1, 1]} : vector<6x32xf32> to vector<1x32xf32>
    %181 = vector.extract_strided_slice %178 {offsets = [2, 0], sizes = [1, 32], strides = [1, 1]} : vector<6x32xf32> to vector<1x32xf32>
    %182 = vector.extract_strided_slice %178 {offsets = [3, 0], sizes = [1, 32], strides = [1, 1]} : vector<6x32xf32> to vector<1x32xf32>
    %183 = vector.extract_strided_slice %178 {offsets = [4, 0], sizes = [1, 32], strides = [1, 1]} : vector<6x32xf32> to vector<1x32xf32>
    %184 = vector.extract_strided_slice %178 {offsets = [5, 0], sizes = [1, 32], strides = [1, 1]} : vector<6x32xf32> to vector<1x32xf32>
    %185 = arith.truncf %176 : vector<8x32xf32> to vector<8x32xbf16>
    %c1_58 = arith.constant 1 : index
    %c0_59 = arith.constant 0 : index
    %c0_60 = arith.constant 0 : index
    %186 = vector.load %arg4[%c1_58, %c0_59, %c0_60] : memref<2x32x96xbf16, #tpu.memory_space<vmem>>, vector<1x32x96xbf16>
    %187 = vector.shape_cast %186 : vector<1x32x96xbf16> to vector<32x96xbf16>
    %cst_61 = arith.constant dense<0.000000e+00> : vector<8x96xf32>
    %188 = tpu.matmul %185, %187, %cst_61 {dimension_numbers = #tpu.dot_dimension_numbers<[1], [0], [0], [1], [0, 0, 1, 1], [], []>} : vector<8x32xbf16>, vector<32x96xbf16>, vector<8x96xf32> -> vector<8x96xf32>
    %189 = vector.extract_strided_slice %188 {offsets = [0, 0], sizes = [8, 8], strides = [1, 1]} : vector<8x96xf32> to vector<8x8xf32>
    %190 = arith.truncf %189 : vector<8x8xf32> to vector<8x8xbf16>
    %191 = vector.extract_strided_slice %188 {offsets = [0, 32], sizes = [8, 8], strides = [1, 1]} : vector<8x96xf32> to vector<8x8xf32>
    %192 = arith.truncf %191 : vector<8x8xf32> to vector<8x8xbf16>
    %193 = vector.extract_strided_slice %188 {offsets = [0, 64], sizes = [8, 8], strides = [1, 1]} : vector<8x96xf32> to vector<8x8xf32>
    %194 = arith.truncf %193 : vector<8x8xf32> to vector<8x8xbf16>
    %cst_62 = arith.constant dense<0.000000e+00> : vector<8x8xf32>
    %195 = tpu.matmul %190, %192, %cst_62 {dimension_numbers = #tpu.dot_dimension_numbers<[1], [1], [0], [0], [0, 0, 1, 0], [], []>} : vector<8x8xbf16>, vector<8x8xbf16>, vector<8x8xf32> -> vector<8x8xf32>
    %196 = arith.addf %195, %15 : vector<8x8xf32>
    %cst_63 = arith.constant dense<0xFF800000> : vector<8xf32>
    %197 = vector.multi_reduction <maximumf>, %196, %cst_63 [1] : vector<8x8xf32> to vector<8xf32>
    %198 = vector.shape_cast %197 : vector<8xf32> to vector<8x1xf32>
    %199 = vector.broadcast %198 : vector<8x1xf32> to vector<8x8xf32>
    %200 = arith.subf %196, %199 : vector<8x8xf32>
    %201 = math.exp %200 : vector<8x8xf32>
    %cst_64 = arith.constant dense<0.000000e+00> : vector<8xf32>
    %202 = vector.multi_reduction <add>, %201, %cst_64 [1] : vector<8x8xf32> to vector<8xf32>
    %203 = vector.shape_cast %202 : vector<8xf32> to vector<8x1xf32>
    %204 = tpu.reciprocal %203 {approx = true} : vector<8x1xf32> -> vector<8x1xf32>
    %205 = vector.broadcast %204 : vector<8x1xf32> to vector<8x8xf32>
    %206 = arith.mulf %201, %205 : vector<8x8xf32>
    %207 = arith.truncf %206 : vector<8x8xf32> to vector<8x8xbf16>
    %cst_65 = arith.constant dense<0.000000e+00> : vector<8x8xf32>
    %208 = tpu.matmul %207, %194, %cst_65 {dimension_numbers = #tpu.dot_dimension_numbers<[1], [0], [0], [1], [0, 0, 1, 1], [], []>} : vector<8x8xbf16>, vector<8x8xbf16>, vector<8x8xf32> -> vector<8x8xf32>
    %209 = vector.extract_strided_slice %188 {offsets = [0, 8], sizes = [8, 8], strides = [1, 1]} : vector<8x96xf32> to vector<8x8xf32>
    %210 = arith.truncf %209 : vector<8x8xf32> to vector<8x8xbf16>
    %211 = vector.extract_strided_slice %188 {offsets = [0, 40], sizes = [8, 8], strides = [1, 1]} : vector<8x96xf32> to vector<8x8xf32>
    %212 = arith.truncf %211 : vector<8x8xf32> to vector<8x8xbf16>
    %213 = vector.extract_strided_slice %188 {offsets = [0, 72], sizes = [8, 8], strides = [1, 1]} : vector<8x96xf32> to vector<8x8xf32>
    %214 = arith.truncf %213 : vector<8x8xf32> to vector<8x8xbf16>
    %cst_66 = arith.constant dense<0.000000e+00> : vector<8x8xf32>
    %215 = tpu.matmul %210, %212, %cst_66 {dimension_numbers = #tpu.dot_dimension_numbers<[1], [1], [0], [0], [0, 0, 1, 0], [], []>} : vector<8x8xbf16>, vector<8x8xbf16>, vector<8x8xf32> -> vector<8x8xf32>
    %216 = arith.addf %215, %15 : vector<8x8xf32>
    %cst_67 = arith.constant dense<0xFF800000> : vector<8xf32>
    %217 = vector.multi_reduction <maximumf>, %216, %cst_67 [1] : vector<8x8xf32> to vector<8xf32>
    %218 = vector.shape_cast %217 : vector<8xf32> to vector<8x1xf32>
    %219 = vector.broadcast %218 : vector<8x1xf32> to vector<8x8xf32>
    %220 = arith.subf %216, %219 : vector<8x8xf32>
    %221 = math.exp %220 : vector<8x8xf32>
    %cst_68 = arith.constant dense<0.000000e+00> : vector<8xf32>
    %222 = vector.multi_reduction <add>, %221, %cst_68 [1] : vector<8x8xf32> to vector<8xf32>
    %223 = vector.shape_cast %222 : vector<8xf32> to vector<8x1xf32>
    %224 = tpu.reciprocal %223 {approx = true} : vector<8x1xf32> -> vector<8x1xf32>
    %225 = vector.broadcast %224 : vector<8x1xf32> to vector<8x8xf32>
    %226 = arith.mulf %221, %225 : vector<8x8xf32>
    %227 = arith.truncf %226 : vector<8x8xf32> to vector<8x8xbf16>
    %cst_69 = arith.constant dense<0.000000e+00> : vector<8x8xf32>
    %228 = tpu.matmul %227, %214, %cst_69 {dimension_numbers = #tpu.dot_dimension_numbers<[1], [0], [0], [1], [0, 0, 1, 1], [], []>} : vector<8x8xbf16>, vector<8x8xbf16>, vector<8x8xf32> -> vector<8x8xf32>
    %229 = vector.extract_strided_slice %188 {offsets = [0, 16], sizes = [8, 8], strides = [1, 1]} : vector<8x96xf32> to vector<8x8xf32>
    %230 = arith.truncf %229 : vector<8x8xf32> to vector<8x8xbf16>
    %231 = vector.extract_strided_slice %188 {offsets = [0, 48], sizes = [8, 8], strides = [1, 1]} : vector<8x96xf32> to vector<8x8xf32>
    %232 = arith.truncf %231 : vector<8x8xf32> to vector<8x8xbf16>
    %233 = vector.extract_strided_slice %188 {offsets = [0, 80], sizes = [8, 8], strides = [1, 1]} : vector<8x96xf32> to vector<8x8xf32>
    %234 = arith.truncf %233 : vector<8x8xf32> to vector<8x8xbf16>
    %cst_70 = arith.constant dense<0.000000e+00> : vector<8x8xf32>
    %235 = tpu.matmul %230, %232, %cst_70 {dimension_numbers = #tpu.dot_dimension_numbers<[1], [1], [0], [0], [0, 0, 1, 0], [], []>} : vector<8x8xbf16>, vector<8x8xbf16>, vector<8x8xf32> -> vector<8x8xf32>
    %236 = arith.addf %235, %15 : vector<8x8xf32>
    %cst_71 = arith.constant dense<0xFF800000> : vector<8xf32>
    %237 = vector.multi_reduction <maximumf>, %236, %cst_71 [1] : vector<8x8xf32> to vector<8xf32>
    %238 = vector.shape_cast %237 : vector<8xf32> to vector<8x1xf32>
    %239 = vector.broadcast %238 : vector<8x1xf32> to vector<8x8xf32>
    %240 = arith.subf %236, %239 : vector<8x8xf32>
    %241 = math.exp %240 : vector<8x8xf32>
    %cst_72 = arith.constant dense<0.000000e+00> : vector<8xf32>
    %242 = vector.multi_reduction <add>, %241, %cst_72 [1] : vector<8x8xf32> to vector<8xf32>
    %243 = vector.shape_cast %242 : vector<8xf32> to vector<8x1xf32>
    %244 = tpu.reciprocal %243 {approx = true} : vector<8x1xf32> -> vector<8x1xf32>
    %245 = vector.broadcast %244 : vector<8x1xf32> to vector<8x8xf32>
    %246 = arith.mulf %241, %245 : vector<8x8xf32>
    %247 = arith.truncf %246 : vector<8x8xf32> to vector<8x8xbf16>
    %cst_73 = arith.constant dense<0.000000e+00> : vector<8x8xf32>
    %248 = tpu.matmul %247, %234, %cst_73 {dimension_numbers = #tpu.dot_dimension_numbers<[1], [0], [0], [1], [0, 0, 1, 1], [], []>} : vector<8x8xbf16>, vector<8x8xbf16>, vector<8x8xf32> -> vector<8x8xf32>
    %249 = vector.extract_strided_slice %188 {offsets = [0, 24], sizes = [8, 8], strides = [1, 1]} : vector<8x96xf32> to vector<8x8xf32>
    %250 = arith.truncf %249 : vector<8x8xf32> to vector<8x8xbf16>
    %251 = vector.extract_strided_slice %188 {offsets = [0, 56], sizes = [8, 8], strides = [1, 1]} : vector<8x96xf32> to vector<8x8xf32>
    %252 = arith.truncf %251 : vector<8x8xf32> to vector<8x8xbf16>
    %253 = vector.extract_strided_slice %188 {offsets = [0, 88], sizes = [8, 8], strides = [1, 1]} : vector<8x96xf32> to vector<8x8xf32>
    %254 = arith.truncf %253 : vector<8x8xf32> to vector<8x8xbf16>
    %cst_74 = arith.constant dense<0.000000e+00> : vector<8x8xf32>
    %255 = tpu.matmul %250, %252, %cst_74 {dimension_numbers = #tpu.dot_dimension_numbers<[1], [1], [0], [0], [0, 0, 1, 0], [], []>} : vector<8x8xbf16>, vector<8x8xbf16>, vector<8x8xf32> -> vector<8x8xf32>
    %256 = arith.addf %255, %15 : vector<8x8xf32>
    %cst_75 = arith.constant dense<0xFF800000> : vector<8xf32>
    %257 = vector.multi_reduction <maximumf>, %256, %cst_75 [1] : vector<8x8xf32> to vector<8xf32>
    %258 = vector.shape_cast %257 : vector<8xf32> to vector<8x1xf32>
    %259 = vector.broadcast %258 : vector<8x1xf32> to vector<8x8xf32>
    %260 = arith.subf %256, %259 : vector<8x8xf32>
    %261 = math.exp %260 : vector<8x8xf32>
    %cst_76 = arith.constant dense<0.000000e+00> : vector<8xf32>
    %262 = vector.multi_reduction <add>, %261, %cst_76 [1] : vector<8x8xf32> to vector<8xf32>
    %263 = vector.shape_cast %262 : vector<8xf32> to vector<8x1xf32>
    %264 = tpu.reciprocal %263 {approx = true} : vector<8x1xf32> -> vector<8x1xf32>
    %265 = vector.broadcast %264 : vector<8x1xf32> to vector<8x8xf32>
    %266 = arith.mulf %261, %265 : vector<8x8xf32>
    %267 = arith.truncf %266 : vector<8x8xf32> to vector<8x8xbf16>
    %cst_77 = arith.constant dense<0.000000e+00> : vector<8x8xf32>
    %268 = tpu.matmul %267, %254, %cst_77 {dimension_numbers = #tpu.dot_dimension_numbers<[1], [0], [0], [1], [0, 0, 1, 1], [], []>} : vector<8x8xbf16>, vector<8x8xbf16>, vector<8x8xf32> -> vector<8x8xf32>
    %269 = tpu.concatenate %208, %228, %248, %268 in 1 : vector<8x8xf32>, vector<8x8xf32>, vector<8x8xf32>, vector<8x8xf32> -> vector<8x32xf32>
    %270 = arith.truncf %269 : vector<8x32xf32> to vector<8x32xbf16>
    %c1_78 = arith.constant 1 : index
    %c0_79 = arith.constant 0 : index
    %c0_80 = arith.constant 0 : index
    %271 = vector.load %arg5[%c1_78, %c0_79, %c0_80] : memref<2x32x32xbf16, #tpu.memory_space<vmem>>, vector<1x32x32xbf16>
    %272 = vector.shape_cast %271 : vector<1x32x32xbf16> to vector<32x32xbf16>
    %cst_81 = arith.constant dense<0.000000e+00> : vector<8x32xf32>
    %273 = tpu.matmul %270, %272, %cst_81 {dimension_numbers = #tpu.dot_dimension_numbers<[1], [0], [0], [1], [0, 0, 1, 1], [], []>} : vector<8x32xbf16>, vector<32x32xbf16>, vector<8x32xf32> -> vector<8x32xf32>
    %274 = vector.broadcast %179 : vector<1x32xf32> to vector<8x32xf32>
    %275 = arith.addf %273, %274 : vector<8x32xf32>
    %276 = arith.addf %176, %275 : vector<8x32xf32>
    %cst_82 = arith.constant dense<0.000000e+00> : vector<8xf32>
    %277 = vector.multi_reduction <add>, %276, %cst_82 [1] : vector<8x32xf32> to vector<8xf32>
    %278 = vector.shape_cast %277 : vector<8xf32> to vector<8x1xf32>
    %cst_83 = arith.constant 3.200000e+01 : f32
    %279 = vector.broadcast %cst_83 : f32 to vector<8x1xf32>
    %280 = arith.divf %278, %279 : vector<8x1xf32>
    %281 = vector.broadcast %280 : vector<8x1xf32> to vector<8x32xf32>
    %282 = arith.subf %276, %281 : vector<8x32xf32>
    %283 = arith.mulf %282, %282 : vector<8x32xf32>
    %cst_84 = arith.constant dense<0.000000e+00> : vector<8xf32>
    %284 = vector.multi_reduction <add>, %283, %cst_84 [1] : vector<8x32xf32> to vector<8xf32>
    %285 = vector.shape_cast %284 : vector<8xf32> to vector<8x1xf32>
    %cst_85 = arith.constant 3.200000e+01 : f32
    %286 = vector.broadcast %cst_85 : f32 to vector<8x1xf32>
    %287 = arith.divf %285, %286 : vector<8x1xf32>
    %288 = vector.broadcast %280 : vector<8x1xf32> to vector<8x32xf32>
    %289 = arith.subf %276, %288 : vector<8x32xf32>
    %cst_86 = arith.constant 9.99999974E-6 : f32
    %290 = vector.broadcast %cst_86 : f32 to vector<8x1xf32>
    %291 = arith.addf %287, %290 : vector<8x1xf32>
    %292 = math.rsqrt %291 : vector<8x1xf32>
    %293 = vector.broadcast %292 : vector<8x1xf32> to vector<8x32xf32>
    %294 = arith.mulf %289, %293 : vector<8x32xf32>
    %295 = vector.broadcast %180 : vector<1x32xf32> to vector<8x32xf32>
    %296 = arith.mulf %294, %295 : vector<8x32xf32>
    %297 = vector.broadcast %181 : vector<1x32xf32> to vector<8x32xf32>
    %298 = arith.addf %296, %297 : vector<8x32xf32>
    %299 = arith.truncf %298 : vector<8x32xf32> to vector<8x32xbf16>
    %c1_87 = arith.constant 1 : index
    %c0_88 = arith.constant 0 : index
    %c0_89 = arith.constant 0 : index
    %300 = vector.load %arg6[%c1_87, %c0_88, %c0_89] : memref<2x32x128xbf16, #tpu.memory_space<vmem>>, vector<1x32x128xbf16>
    %301 = vector.shape_cast %300 : vector<1x32x128xbf16> to vector<32x128xbf16>
    %cst_90 = arith.constant dense<0.000000e+00> : vector<8x128xf32>
    %302 = tpu.matmul %299, %301, %cst_90 {dimension_numbers = #tpu.dot_dimension_numbers<[1], [0], [0], [1], [0, 0, 1, 1], [], []>} : vector<8x32xbf16>, vector<32x128xbf16>, vector<8x128xf32> -> vector<8x128xf32>
    %c1_91 = arith.constant 1 : index
    %c0_92 = arith.constant 0 : index
    %c0_93 = arith.constant 0 : index
    %303 = vector.load %arg9[%c1_91, %c0_92, %c0_93] : memref<2x1x128xf32, #tpu.memory_space<vmem>>, vector<1x1x128xf32>
    %304 = vector.shape_cast %303 : vector<1x1x128xf32> to vector<1x128xf32>
    %305 = vector.broadcast %304 : vector<1x128xf32> to vector<8x128xf32>
    %306 = arith.addf %302, %305 : vector<8x128xf32>
    %cst_94 = arith.constant 0.000000e+00 : f32
    %307 = vector.broadcast %cst_94 : f32 to vector<8x128xf32>
    %308 = arith.maximumf %306, %307 : vector<8x128xf32>
    %309 = arith.truncf %308 : vector<8x128xf32> to vector<8x128xbf16>
    %c1_95 = arith.constant 1 : index
    %c0_96 = arith.constant 0 : index
    %c0_97 = arith.constant 0 : index
    %310 = vector.load %arg7[%c1_95, %c0_96, %c0_97] : memref<2x128x32xbf16, #tpu.memory_space<vmem>>, vector<1x128x32xbf16>
    %311 = vector.shape_cast %310 : vector<1x128x32xbf16> to vector<128x32xbf16>
    %cst_98 = arith.constant dense<0.000000e+00> : vector<8x32xf32>
    %312 = tpu.matmul %309, %311, %cst_98 {dimension_numbers = #tpu.dot_dimension_numbers<[1], [0], [0], [1], [0, 0, 1, 1], [], []>} : vector<8x128xbf16>, vector<128x32xbf16>, vector<8x32xf32> -> vector<8x32xf32>
    %313 = vector.broadcast %182 : vector<1x32xf32> to vector<8x32xf32>
    %314 = arith.addf %312, %313 : vector<8x32xf32>
    %315 = arith.addf %298, %314 : vector<8x32xf32>
    %cst_99 = arith.constant dense<0.000000e+00> : vector<8xf32>
    %316 = vector.multi_reduction <add>, %315, %cst_99 [1] : vector<8x32xf32> to vector<8xf32>
    %317 = vector.shape_cast %316 : vector<8xf32> to vector<8x1xf32>
    %cst_100 = arith.constant 3.200000e+01 : f32
    %318 = vector.broadcast %cst_100 : f32 to vector<8x1xf32>
    %319 = arith.divf %317, %318 : vector<8x1xf32>
    %320 = vector.broadcast %319 : vector<8x1xf32> to vector<8x32xf32>
    %321 = arith.subf %315, %320 : vector<8x32xf32>
    %322 = arith.mulf %321, %321 : vector<8x32xf32>
    %cst_101 = arith.constant dense<0.000000e+00> : vector<8xf32>
    %323 = vector.multi_reduction <add>, %322, %cst_101 [1] : vector<8x32xf32> to vector<8xf32>
    %324 = vector.shape_cast %323 : vector<8xf32> to vector<8x1xf32>
    %cst_102 = arith.constant 3.200000e+01 : f32
    %325 = vector.broadcast %cst_102 : f32 to vector<8x1xf32>
    %326 = arith.divf %324, %325 : vector<8x1xf32>
    %327 = vector.broadcast %319 : vector<8x1xf32> to vector<8x32xf32>
    %328 = arith.subf %315, %327 : vector<8x32xf32>
    %cst_103 = arith.constant 9.99999974E-6 : f32
    %329 = vector.broadcast %cst_103 : f32 to vector<8x1xf32>
    %330 = arith.addf %326, %329 : vector<8x1xf32>
    %331 = math.rsqrt %330 : vector<8x1xf32>
    %332 = vector.broadcast %331 : vector<8x1xf32> to vector<8x32xf32>
    %333 = arith.mulf %328, %332 : vector<8x32xf32>
    %334 = vector.broadcast %183 : vector<1x32xf32> to vector<8x32xf32>
    %335 = arith.mulf %333, %334 : vector<8x32xf32>
    %336 = vector.broadcast %184 : vector<1x32xf32> to vector<8x32xf32>
    %337 = arith.addf %335, %336 : vector<8x32xf32>
    %c0_104 = arith.constant 0 : index
    %c0_105 = arith.constant 0 : index
    %338 = vector.load %arg10[%c0_104, %c0_105] : memref<2x32xf32, #tpu.memory_space<vmem>>, vector<2x32xf32>
    %cst_106 = arith.constant dense<0.000000e+00> : vector<8xf32>
    %339 = vector.multi_reduction <add>, %337, %cst_106 [1] : vector<8x32xf32> to vector<8xf32>
    %340 = vector.shape_cast %339 : vector<8xf32> to vector<8x1xf32>
    %cst_107 = arith.constant 3.200000e+01 : f32
    %341 = vector.broadcast %cst_107 : f32 to vector<8x1xf32>
    %342 = arith.divf %340, %341 : vector<8x1xf32>
    %343 = vector.broadcast %342 : vector<8x1xf32> to vector<8x32xf32>
    %344 = arith.subf %337, %343 : vector<8x32xf32>
    %345 = arith.mulf %344, %344 : vector<8x32xf32>
    %cst_108 = arith.constant dense<0.000000e+00> : vector<8xf32>
    %346 = vector.multi_reduction <add>, %345, %cst_108 [1] : vector<8x32xf32> to vector<8xf32>
    %347 = vector.shape_cast %346 : vector<8xf32> to vector<8x1xf32>
    %cst_109 = arith.constant 3.200000e+01 : f32
    %348 = vector.broadcast %cst_109 : f32 to vector<8x1xf32>
    %349 = arith.divf %347, %348 : vector<8x1xf32>
    %350 = vector.broadcast %342 : vector<8x1xf32> to vector<8x32xf32>
    %351 = arith.subf %337, %350 : vector<8x32xf32>
    %cst_110 = arith.constant 9.99999974E-6 : f32
    %352 = vector.broadcast %cst_110 : f32 to vector<8x1xf32>
    %353 = arith.addf %349, %352 : vector<8x1xf32>
    %354 = math.rsqrt %353 : vector<8x1xf32>
    %355 = vector.broadcast %354 : vector<8x1xf32> to vector<8x32xf32>
    %356 = arith.mulf %351, %355 : vector<8x32xf32>
    %357 = vector.extract_strided_slice %338 {offsets = [0, 0], sizes = [1, 32], strides = [1, 1]} : vector<2x32xf32> to vector<1x32xf32>
    %358 = vector.broadcast %357 : vector<1x32xf32> to vector<8x32xf32>
    %359 = arith.mulf %356, %358 : vector<8x32xf32>
    %360 = vector.extract_strided_slice %338 {offsets = [1, 0], sizes = [1, 32], strides = [1, 1]} : vector<2x32xf32> to vector<1x32xf32>
    %361 = vector.broadcast %360 : vector<1x32xf32> to vector<8x32xf32>
    %362 = arith.addf %359, %361 : vector<8x32xf32>
    %363 = arith.truncf %362 : vector<8x32xf32> to vector<8x32xbf16>
    %c0_111 = arith.constant 0 : index
    %c0_112 = arith.constant 0 : index
    %364 = vector.load %arg11[%c0_111, %c0_112] : memref<32x128xbf16, #tpu.memory_space<vmem>>, vector<32x128xbf16>
    %cst_113 = arith.constant dense<0.000000e+00> : vector<8x128xf32>
    %365 = tpu.matmul %363, %364, %cst_113 {dimension_numbers = #tpu.dot_dimension_numbers<[1], [0], [0], [1], [0, 0, 1, 1], [], []>} : vector<8x32xbf16>, vector<32x128xbf16>, vector<8x128xf32> -> vector<8x128xf32>
    %c0_114 = arith.constant 0 : index
    %c0_115 = arith.constant 0 : index
    %366 = vector.load %arg12[%c0_114, %c0_115] : memref<1x128xf32, #tpu.memory_space<vmem>>, vector<1x128xf32>
    %367 = vector.broadcast %366 : vector<1x128xf32> to vector<8x128xf32>
    %368 = arith.addf %365, %367 : vector<8x128xf32>
    %c0_116 = arith.constant 0 : index
    %c0_117 = arith.constant 0 : index
    %369 = vector.load %arg13[%c0_116, %c0_117] : memref<8x128xf32, #tpu.memory_space<vmem>>, vector<8x128xf32>
    tpu.vector_store %arg13[%c0_116, %c0_117], %368 {strides = array<i32>} : memref<8x128xf32, #tpu.memory_space<vmem>>, vector<8x128xf32>,
    return
  }
  func.func @transform_0(%arg0: i32) -> (i32, i32) {
    %c0_i32 = arith.constant 0 : i32
    %c0_i32_0 = arith.constant 0 : i32
    return %arg0, %c0_i32 : i32, i32
  }
  func.func @transform_1(%arg0: i32) -> (i32, i32) {
    %c0_i32 = arith.constant 0 : i32
    %c0_i32_0 = arith.constant 0 : i32
    %c0_i32_1 = arith.constant 0 : i32
    return %c0_i32, %c0_i32_0 : i32, i32
  }
  func.func @transform_2(%arg0: i32) -> (i32, i32) {
    %c0_i32 = arith.constant 0 : i32
    %c0_i32_0 = arith.constant 0 : i32
    %c0_i32_1 = arith.constant 0 : i32
    return %c0_i32, %c0_i32_0 : i32, i32
  }
  func.func @transform_3(%arg0: i32) -> (i32, i32, i32) {
    %c0_i32 = arith.constant 0 : i32
    %c0_i32_0 = arith.constant 0 : i32
    %c0_i32_1 = arith.constant 0 : i32
    %c0_i32_2 = arith.constant 0 : i32
    return %c0_i32, %c0_i32_0, %c0_i32_1 : i32, i32, i32
  }
  func.func @transform_4(%arg0: i32) -> (i32, i32, i32) {
    %c0_i32 = arith.constant 0 : i32
    %c0_i32_0 = arith.constant 0 : i32
    %c0_i32_1 = arith.constant 0 : i32
    %c0_i32_2 = arith.constant 0 : i32
    return %c0_i32, %c0_i32_0, %c0_i32_1 : i32, i32, i32
  }
  func.func @transform_5(%arg0: i32) -> (i32, i32, i32) {
    %c0_i32 = arith.constant 0 : i32
    %c0_i32_0 = arith.constant 0 : i32
    %c0_i32_1 = arith.constant 0 : i32
    %c0_i32_2 = arith.constant 0 : i32
    return %c0_i32, %c0_i32_0, %c0_i32_1 : i32, i32, i32
  }
  func.func @transform_6(%arg0: i32) -> (i32, i32, i32) {
    %c0_i32 = arith.constant 0 : i32
    %c0_i32_0 = arith.constant 0 : i32
    %c0_i32_1 = arith.constant 0 : i32
    %c0_i32_2 = arith.constant 0 : i32
    return %c0_i32, %c0_i32_0, %c0_i32_1 : i32, i32, i32
  }
  func.func @transform_7(%arg0: i32) -> (i32, i32, i32) {
    %c0_i32 = arith.constant 0 : i32
    %c0_i32_0 = arith.constant 0 : i32
    %c0_i32_1 = arith.constant 0 : i32
    %c0_i32_2 = arith.constant 0 : i32
    return %c0_i32, %c0_i32_0, %c0_i32_1 : i32, i32, i32
  }
  func.func @transform_8(%arg0: i32) -> (i32, i32, i32) {
    %c0_i32 = arith.constant 0 : i32
    %c0_i32_0 = arith.constant 0 : i32
    %c0_i32_1 = arith.constant 0 : i32
    %c0_i32_2 = arith.constant 0 : i32
    return %c0_i32, %c0_i32_0, %c0_i32_1 : i32, i32, i32
  }
  func.func @transform_9(%arg0: i32) -> (i32, i32) {
    %c0_i32 = arith.constant 0 : i32
    %c0_i32_0 = arith.constant 0 : i32
    %c0_i32_1 = arith.constant 0 : i32
    return %c0_i32, %c0_i32_0 : i32, i32
  }
  func.func @transform_10(%arg0: i32) -> (i32, i32) {
    %c0_i32 = arith.constant 0 : i32
    %c0_i32_0 = arith.constant 0 : i32
    %c0_i32_1 = arith.constant 0 : i32
    return %c0_i32, %c0_i32_0 : i32, i32
  }
  func.func @transform_11(%arg0: i32) -> (i32, i32) {
    %c0_i32 = arith.constant 0 : i32
    %c0_i32_0 = arith.constant 0 : i32
    %c0_i32_1 = arith.constant 0 : i32
    return %c0_i32, %c0_i32_0 : i32, i32
  }
  func.func @transform_12(%arg0: i32) -> (i32, i32) {
    %c0_i32 = arith.constant 0 : i32
    %c0_i32_0 = arith.constant 0 : i32
    return %arg0, %c0_i32 : i32, i32
  }
}

</mosaic_0001>

<bundles_post_ra>
// kernel: gpt_forward.1
= control target key start
LH: loop header
LB: loop body
LE: loop exit
PB: predicated region body
PF: predicated region fallthrough
CT: control target
= control target key end

     0   :  { %s2623_s0 = inlined_call_operand.vmem [shape: s32[16,1], index: 0, kind: input, shape index: {}]   ;;  %s2624_s1 = inlined_call_operand.hbm [shape: f32[16,32], index: 1, kind: input, shape index: {}]   ;;  %s2625_s2 = inlined_call_operand.vmem [shape: f32[8,32], index: 2, kind: input, shape index: {}]   ;;  %s2626_s3 = inlined_call_operand.hbm [shape: bf16[2,32,96], index: 3, kind: input, shape index: {}]   ;;  %s2627_s4 = inlined_call_operand.hbm [shape: bf16[2,32,32], index: 4, kind: input, shape index: {}]   ;;  %s2628_s5 = inlined_call_operand.hbm [shape: bf16[2,32,128], index: 5, kind: input, shape index: {}]   ;;  %s2629_s6 = inlined_call_operand.hbm [shape: bf16[2,128,32], index: 6, kind: input, shape index: {}]   ;;  %s2630_s7 = inlined_call_operand.hbm [shape: f32[2,6,32], index: 7, kind: input, shape index: {}]   ;;  %s2631_s8 = inlined_call_operand.vmem [shape: f32[2,1,128], index: 8, kind: input, shape index: {}]   ;;  %s2632_s9 = inlined_call_operand.vmem [shape: f32[2,32], index: 9, kind: input, shape index: {}]   ;;  %s2633_s10 = inlined_call_operand.vmem [shape: bf16[32,128], index: 10, kind: input, shape index: {}]   ;;  %s2634_s11 = inlined_call_operand.vmem [shape: f32[1,128], index: 11, kind: input, shape index: {}]   ;;  %s2635_s12 = inlined_call_operand.vmem [shape: f32[16,128], index: 12, kind: output, shape index: {}]  }
   0x1   :  { %2636 = sst [smem:[#allocation16_spill]] %s2624_s1 }
   0x2   :  { %2637 = sst [smem:[#allocation17_spill]] %s2626_s3 }
   0x3   :  { %2638 = sst [smem:[#allocation18_spill]] %s2628_s5 }
   0x4   :  { %17 = vsyncpa [#allocation3], 0 }
   0x5   :  { %18 = vsyncpa [#allocation5], 0 }
   0x6   :  { %19 = vsyncpa [#allocation8], 0 }
   0x7   :  { %20 = vsyncpa [#allocation11], 0  ;;  %s2334_s21 = smov 0  }
   0x8 LB: > { %s2639_s3 = sld [smem:[#allocation17_spill]]  ;;  %s2343_s25 = sadd.s32 4294967295, %s2239_s21   ;;  %s2239_s21 = sphi %s2334_s21, %s26_s21  }
   0x9   : > { %p1703_p0 = scmp.ge.s32.totalorder %s2239_s21, 1  ;;  %p314_p1 = scmp.lt.s32.totalorder %s2239_s21, 3 }
   0xa   : > { %p1941_p2 = scmp.eq.s32.totalorder %s2343_s25, 0  ;;  %s2241_s27 = smov [#allocation4]  }
   0xb   : > { %p2348_p3 = pnand %p1703_p0, %p314_p1  ;;  %s344_s28 = sshll.u32 %s2241_s27, 4  ;;  %s345_s28 = int_to_ptr.vmem [resolvable:$true] %s344_s28 }
   0xc   : > { %s2641_s5 = sld [smem:[#allocation18_spill]]  ;;  %s2242_s15 = smov [#allocation7]  }
   0xd   : > { %p1922_p4 = pneg %p2348_p3  ;;  %s372_s16 = sshll.u32 %s2242_s15, 4  ;;  %s373_s16 = int_to_ptr.vmem [resolvable:$true] %s372_s16 }
   0xe   : > { %s342_s24 = sshll.u32 %s2639_s3, 4  ;;  %s2643_s1 = sld [smem:[#allocation16_spill]]  ;;  %s343_s24 = int_to_ptr.hbm [resolvable:$true] %s342_s24 }
   0xf   : > { %p2359_p5 = pnand %p1941_p2, %p1922_p4  ;;  %s2243_s20 = smov 64  }
  0x10   : > { %s2244_s22 = smov 4   ;;  %s2245_s23 = smov [#allocation2]  }
  0x11   : > { %1928 = dma.hbm_to_vmem [thread:$0]  (!%p2359_p5), %s343_s24, 512, %s345_s28, [#allocation5], %s2243_s20, %s2243_s20, %s2244_s22  }
  0x12   : > { %s370_s13 = sshll.u32 %s2641_s5, 4  ;;  %s327_s27 = sshll.u32 %s2245_s23, 4  ;;  %s371_s13 = int_to_ptr.hbm [resolvable:$true] %s370_s13  ;;  %s328_s27 = int_to_ptr.vmem [resolvable:$true] %s327_s27 }
  0x13   : > { %1934 = dma.hbm_to_vmem [thread:$0]  (!%p2359_p5), %s371_s13, 512, %s373_s16, [#allocation8], %s2243_s20, %s2243_s20, %s2244_s22  }
  0x14   : > { %s325_s19 = sshll.u32 %s2643_s1, 4  ;;  %s2246_s29 = smov 128   ;;  %s326_s19 = int_to_ptr.hbm [resolvable:$true] %s325_s19 }
  0x15   : > { %s2247_s30 = smov 8   ;;  %s356_s18 = sshll.u32 %s2627_s4, 4  ;;  %s357_s18 = int_to_ptr.hbm [resolvable:$true] %s356_s18 }
  0x16   : > { %1925 = dma.hbm_to_vmem [thread:$0]  (!%p2359_p5), %s326_s19, 256, %s328_s27, [#allocation3], %s2246_s29, %s2246_s29, %s2247_s30  }
  0x17   : > { %s2248_s1 = smov [#allocation6]   ;;  %s384_s13 = sshll.u32 %s2629_s6, 4  ;;  %s385_s13 = int_to_ptr.hbm [resolvable:$true] %s384_s13 }
  0x18   : > { %s358_s3 = sshll.u32 %s2248_s1, 4  ;;  %s2249_s16 = smov [#allocation9]   ;;  %s359_s3 = int_to_ptr.vmem [resolvable:$true] %s358_s3 }
  0x19   : > { %1931 = dma.hbm_to_vmem [thread:$0]  (!%p2359_p5), %s357_s18, 512, %s359_s3, [#allocation5], %s2243_s20, %s2243_s20, %s2244_s22  }
  0x1a   : > { %s386_s23 = sshll.u32 %s2249_s16, 4  ;;  %s398_s27 = sshll.u32 %s2630_s7, 4  ;;  %s387_s23 = int_to_ptr.vmem [resolvable:$true] %s386_s23  ;;  %s399_s27 = int_to_ptr.hbm [resolvable:$true] %s398_s27 }
  0x1b   : > { %1937 = dma.hbm_to_vmem [thread:$0]  (!%p2359_p5), %s385_s13, 2048, %s387_s23, [#allocation8], %s2243_s20, %s2243_s20, %s2244_s22  }
  0x1c   : > { %s2250_s15 = smov [#allocation10]   ;;  %435 = sbr.rel (%p2348_p3) target bundleno = 4800 (0x12c0), region = 68 }
  0x1d   : > { %s400_s1 = sshll.u32 %s2250_s15, 4  ;;  %s401_s1 = int_to_ptr.vmem [resolvable:$true] %s400_s1 }
  0x1e   : > { %1940 = dma.hbm_to_vmem [thread:$0]  (!%p2359_p5), %s399_s27, 256, %s401_s1, [#allocation11], %s2246_s29, %s2246_s29, %s2247_s30  }
  0x21   : > { %2222 = dma.done.wait (%p1941_p2), [#allocation3], 256  }
  0x22   : > { %2224 = vsyncadd (%p1941_p2), [#allocation3], 4294967040 }
  0x23   : > { %2226 = dma.done.wait (%p1941_p2), [#allocation5], 1024  }
  0x24   : > { %2228 = vsyncadd (%p1941_p2), [#allocation5], 4294966272 }
  0x25   : > { %2230 = dma.done.wait (%p1941_p2), [#allocation8], 2560  }
  0x26   : > { %2232 = vsyncadd (%p1941_p2), [#allocation8], 4294964736 }
  0x27   : > { %2234 = dma.done.wait (%p1941_p2), [#allocation11], 256  }
  0x28   : > { %2236 = vsyncadd (%p1941_p2), [#allocation11], 4294967040  ;;  %p501_p6 = scmp.lt.s32.totalorder %s2343_s25, 1  ;;  %v2251_v0 = vmov 0   ;;  %v520_v2 = vld [vmem:[#allocation2 + $0x8] sm:$0xff]  ;;  %v519_v3 = vld [vmem:[#allocation2] sm:$0xff]  ;;  %v511_v5 = vlaneseq }
  0x29   : > { %1989 = vset.pattern.permute.xlu0 %v2251_v0  ;;  %540 = vmatpush.msra.mxu0 %v520_v2  ;;  %v1869_v4 = vld [vmem:[#allocation4 + $0x8] sm:$0xff]  ;;  %vm522_vm0 = vcmask 130048   ;;  %v2252_v8 = vmov 0.0   ;;  %v1868_v10 = vld [vmem:[#allocation4] sm:$0xff]  ;;  %v521_v11 = vld [vmem:[%s2625_s2] sm:$0xff]  ;;  %vm568_vm2 = vcmask 261120  }
  0x2a   : > { %s2645_s25 = smov (!%p501_p6, %s2343_s25), 1  ;;  %578 = vmatpush.bf16.msra.mxu1 %v1869_v4  ;;  %v512_v6 = vand.u32 127, %v511_v5  ;;  %s2253_s29 = smov 80   ;;  %vm589_vm3 = vcmask 64512   ;;  %v547_v29 = vshrl.u32 %v511_v5, 7  ;;  %vm626_vm5 = vcmask 1043456  }
  0x2b   : > { %s1718_s3 = sshll.u32 %s2645_s25, 3  ;;  %541 = vmatpush.msra.mxu0 %v519_v3  ;;  %s2254_s30 = smov 88   ;;  %v2260_v30 = vmov -1e+30   ;;  %vm825_vm6 = vcmask 195584  }
  0x2c   : > { %s504_s14 = scalar_lea.vmem %s2623_s0, %s1718_s3  ;;  %s2255_s17 = smov 96   ;;  %vm548_vm4 = vcmp.le.s32.totalorder %v512_v6, %v547_v29 }
  0x2d   : > { %v510_v1 = vld [vmem:[%s504_s14] sm:$0xff]  ;;  %s2256_s18 = smov 72   ;;  %s2257_s24 = smov 120   ;;  %v2449_v31 = vsel %vm548_vm4, 0.0, %v2260_v30 }
  0x2e   : > { %514 = vperm.xlu0 %1989, %v510_v1   ;;  %579 = vmatpush.bf16.msra.mxu1 %v1868_v10  ;;  %s2258_s28 = smov 112   ;;  %s2259_s13 = smov 104  }
  0x2f   : > { %s2261_s16 = smov 64   ;;  %s2262_s23 = smov 40  }
  0x30   : > { %s2263_s19 = smov 56   ;;  %s2264_s27 = smov 48  }
  0x31   : > { %s2265_s15 = smov 8   ;;  %s2266_s1 = smov 24  }
  0x32   : > { %s2267_s5 = smov 16  }
  0xa0   : > { %v515_v7 = vpop.permute.xlu0 %514 }
  0xa1   : > { %vm516_vm1 = vcmp.eq.s32.totalorder %v515_v7, %v512_v6 }
  0xa2   : > { %v1720_v9 = vsel %vm516_vm1, 1.0, %v2252_v8 }
  0xa3   : > { %1721 = vmatmul.msk.f32.vlgmr.msra.gmra.mxu0 %vm522_vm0, %v1720_v9 }
 0x120   : > { %v543_v12 = vpop.f32.mrf.mxu0 }
 0x121   : > { %v2419_v13 = vadd.f32 %v543_v12, %v521_v11 }
 0x123   : > { %v551_v14 = vpack.c.bf16 %v2419_v13, %v2419_v13 }
 0x125   : > { %1730 = vmatmul.msk.bf16.vlgmr.msra.gmra.mxu1 %vm568_vm2, %v551_v14 }
 0x1a2   : > { %v581_v15 = vpop.f32.mrf.mxu1 }
 0x1a3   : > { %v2424_v16 = vpack.c.bf16 %v581_v15, %v581_v15 }
 0x1a5   : > { %701 = vrot.lane.b32.xlu2 %v2424_v16, %s2253_s29  ;;  %645 = vrot.lane.b32.xlu1 %v2424_v16, %s2254_s30 }
 0x1a6   : > { %587 = vrot.lane.b32.xlu0 %v2424_v16, %s2255_s17 }
 0x1aa   : > { %v583_v17 = vpop.f32.mrf.mxu1 }
 0x1ad   : > { %757 = vrot.lane.b32.xlu2 %v2424_v16, %s2256_s18  ;;  %643 = vrot.lane.b32.xlu1 %v2424_v16, %s2257_s24 }
 0x1ae   : > { %699 = vrot.lane.b32.xlu0 %v2424_v16, %s2258_s28 }
 0x1b5   : > { %755 = vrot.lane.b32.xlu1 %v2424_v16, %s2259_s13 }
 0x1ff   : > { %v702_v18 = vpop.permute.xlu2 %701 }
 0x200   : > { %v707_v19 = vsel %vm589_vm3, %v702_v18, 0 }
 0x201   : > { %716 = vmatpush.bf16.xpose.msrb.mxu1 %v707_v19 }
 0x207   : > { %v758_v20 = vpop.permute.xlu2 %757 }
 0x208   : > { %v763_v24 = vsel %vm589_vm3, %v758_v20, 0 }
 0x217   : > { %v646_v21 = vpop.permute.xlu1 %645 }
 0x218   : > { %v588_v22 = vpop.permute.xlu0 %587  ;;  %v651_v23 = vsel %vm589_vm3, %v646_v21, 0 }
 0x219   : > { %v594_v25 = vsel %vm589_vm3, %v588_v22, 0  ;;  %660 = vmatpush.bf16.xpose.msrb.mxu0 %v651_v23 }
 0x21a   : > { %603 = vmatpush.bf16.xpose.msra.mxu2 %v594_v25 }
 0x21f   : > { %v644_v26 = vpop.permute.xlu1 %643 }
 0x220   : > { %v700_v27 = vpop.permute.xlu0 %699  ;;  %1733 = vmatmul.msk.bf16.vlgmr.msrb.gmra.mxu0 %vm589_vm3, %v644_v26 }
 0x221   : > { %772 = vmatpush.bf16.xpose.msra.mxu0 %v763_v24  ;;  %1731 = vmatmul.msk.bf16.vlgmr.msra.gmra.mxu2 %vm589_vm3, %v2424_v16 }
 0x222   : > { %1735 = vmatmul.msk.bf16.vlgmr.msrb.gmra.mxu1 %vm589_vm3, %v700_v27 }
 0x227   : > { %v756_v28 = vpop.permute.xlu1 %755 }
 0x230   : > { %1737 = vmatmul.msk.bf16.vlgmr.msra.gmra.mxu0 %vm589_vm3, %v756_v28 }
 0x29d   : > { %v662_v32 = vpop.f32.mrf.mxu0 }
 0x29e   : > { %v663_v33 = vadd.f32 %v662_v32, %v2449_v31 }
 0x29f   : > { %v718_v34 = vpop.f32.mrf.mxu1 }
 0x2a0   : > { %v719_v35 = vadd.f32 %v718_v34, %v2449_v31  ;;  %v666_v36 = vsel %vm589_vm3, %v663_v33, -inf }
 0x2a1   : > { %667 = vmax.xlane.f32.xlu0 %v666_v36 }
 0x2a2   : > { %v722_v37 = vsel %vm589_vm3, %v719_v35, -inf }
 0x2a3   : > { %723 = vmax.xlane.f32.xlu1 %v722_v37 }
 0x2a4   : > { %v605_v38 = vpop.f32.mrf.mxu2 }
 0x2a5   : > { %v606_v39 = vadd.f32 %v605_v38, %v2449_v31  ;;  %v664_v40 = vpop.f32.mrf.mxu0  ;;  %v1871_v38 = vld [vmem:[#allocation6 + $0x8] sm:$0xff] }
 0x2a6   : > { %854 = vmatpush.bf16.msra.mxu1 %v1871_v38 }
 0x2a7   : > { %v720_v41 = vpop.f32.mrf.mxu1  ;;  %v609_v42 = vsel %vm589_vm3, %v606_v39, -inf }
 0x2a8   : > { %610 = vmax.xlane.f32.xlu2 %v609_v42 }
 0x2ac   : > { %v607_v43 = vpop.f32.mrf.mxu2 }
 0x2ad   : > { %v774_v44 = vpop.f32.mrf.mxu0 }
 0x2ae   : > { %v775_v45 = vadd.f32 %v774_v44, %v2449_v31 }
 0x2b0   : > { %v778_v46 = vsel %vm589_vm3, %v775_v45, -inf }
 0x2b1   : > { %779 = vmax.xlane.f32.xlu2 %v778_v46 }
 0x2b5   : > { %v776_v47 = vpop.f32.mrf.mxu0 }
 0x2b6   : > { %v2486_v47 = vld [vmem:[#allocation10] sm:$0x3f] }
 0x2bc   : > { %621 = vrot.lane.b32.xlu1 %v2424_v16, %s2261_s16 }
 0x2c4   : > { %790 = vrot.lane.b32.xlu1 %v2424_v16, %s2262_s23 }
 0x314   : > { %v668_v48 = vpop.xlane.xlu0 %667 }
 0x315   : > { %v669_v49 = vsub.f32 %v663_v33, %v668_v48  ;;  %v832_v48 = vperm.slane %v2486_v47, 0 }
 0x316   : > { %v724_v50 = vpop.xlane.xlu1 %723 }
 0x317   : > { %v670_v51 = vmul.f32 1.442695, %v669_v49  ;;  %v725_v52 = vsub.f32 %v719_v35, %v724_v50 }
 0x319   : > { %1993 = vpow2.f32 %v670_v51  ;;  %v726_v53 = vmul.f32 1.442695, %v725_v52 }
 0x31b   : > { %v611_v54 = vpop.xlane.xlu2 %610  ;;  %1995 = vpow2.f32 %v726_v53 }
 0x31c   : > { %v612_v55 = vsub.f32 %v606_v39, %v611_v54  ;;  %v1870_v39 = vld [vmem:[#allocation6] sm:$0xff]  ;;  %v2268_v54 = vmov 32.0  }
 0x31d   : > { %855 = vmatpush.bf16.msra.mxu1 %v1870_v39 }
 0x31e   : > { %v613_v56 = vmul.f32 1.442695, %v612_v55 }
 0x31f   : > { %v1994_v57 = vpop.eup %1993 }
 0x320   : > { %1997 = vpow2.f32 %v613_v56  ;;  %v672_v58 = vsel %vm589_vm3, %v1994_v57, 0.0 }
 0x321   : > { %673 = vadd.xlane.f32.xlu0 %v672_v58  ;;  %v1996_v60 = vpop.eup %1995 }
 0x322   : > { %v728_v1 = vsel %vm589_vm3, %v1996_v60, 0.0 }
 0x324   : > { %v780_v59 = vpop.xlane.xlu2 %779 }
 0x325   : > { %v781_v61 = vsub.f32 %v775_v45, %v780_v59 }
 0x326   : > { %v1998_v62 = vpop.eup %1997 }
 0x327   : > { %v782_v63 = vmul.f32 1.442695, %v781_v61  ;;  %v615_v0 = vsel %vm589_vm3, %v1998_v62, 0.0 }
 0x328   : > { %616 = vadd.xlane.f32.xlu2 %v615_v0 }
 0x329   : > { %1999 = vpow2.f32 %v782_v63  ;;  %729 = vadd.xlane.f32.xlu0 %v728_v1  ;;  %v1873_v1 = vld [vmem:[#allocation7 + $0x8] sm:$0xff] }
 0x32e   : > { %v622_v2 = vpop.permute.xlu1 %621 }
 0x32f   : > { %v628_v3 = vsel %vm626_vm5, %v622_v2, 0  ;;  %v2000_v4 = vpop.eup %1999  ;;  %v1872_v2 = vld [vmem:[#allocation7] sm:$0xff] }
 0x330   : > { %637 = vmatpush.bf16.msrb.mxu2 %v628_v3  ;;  %v784_v5 = vsel %vm589_vm3, %v2000_v4, 0.0  ;;  %v1881_v3 = vld [vmem:[#allocation9 + $0x38] sm:$0xff] }
 0x331   : > { %785 = vadd.xlane.f32.xlu0 %v784_v5  ;;  %999 = vmatpush.bf16.msrb.mxu0 %v1881_v3 }
 0x336   : > { %v791_v11 = vpop.permute.xlu1 %790 }
 0x337   : > { %v796_v18 = vsel %vm626_vm5, %v791_v11, 0 }
 0x340   : > { %678 = vrot.lane.b32.xlu2 %v2424_v16, %s2263_s19 }
 0x345   : > { %734 = vrot.lane.b32.xlu0 %v2424_v16, %s2264_s27 }
 0x394   : > { %v674_v6 = vpop.xlane.xlu0 %673 }
 0x395   : > { %2001 = vrcp.f32 %v674_v6  ;;  %v1880_v6 = vld [vmem:[#allocation9 + $0x30] sm:$0xff] }
 0x396   : > { %1000 = vmatpush.bf16.msrb.mxu0 %v1880_v6 }
 0x39b   : > { %v617_v7 = vpop.xlane.xlu2 %616  ;;  %v2002_v9 = vpop.eup %2001 }
 0x39c   : > { %2003 = vrcp.f32 %v617_v7  ;;  %v730_v8 = vpop.xlane.xlu0 %729  ;;  %v676_v12 = vmul.f32 %v2002_v9, %v1994_v57  ;;  %v1878_v9 = vld [vmem:[#allocation9 + $0x20] sm:$0xff] }
 0x39e   : > { %v677_v16 = vpack.c.bf16 %v676_v12, %v676_v12  ;;  %v1877_v12 = vld [vmem:[#allocation9 + $0x18] sm:$0xff] }
 0x3a2   : > { %v2004_v10 = vpop.eup %2003 }
 0x3a3   : > { %v619_v14 = vmul.f32 %v2004_v10, %v1998_v62  ;;  %v679_v15 = vpop.permute.xlu2 %678 }
 0x3a4   : > { %v684_v17 = vsel %vm626_vm5, %v679_v15, 0  ;;  %v786_v20 = vpop.xlane.xlu0 %785 }
 0x3a5   : > { %693 = vmatpush.bf16.msra.mxu3 %v684_v17  ;;  %v620_v19 = vpack.c.bf16 %v619_v14, %v619_v14  ;;  %2005 = vrcp.f32 %v786_v20  ;;  %v1876_v17 = vld [vmem:[#allocation9 + $0x10] sm:$0xff]  ;;  %v891_v20 = vperm.slane %v2486_v47, 1 }
 0x3a6   : > { %2007 = vrcp.f32 %v730_v8  ;;  %v1879_v8 = vld [vmem:[#allocation9 + $0x28] sm:$0xff] }
 0x3a7   : > { %1732 = vmatmul.msk.bf16.vlgmr.msrb.gmra.mxu2 %vm589_vm3, %v620_v19  ;;  %2009 = vrcp.f32 %v2268_v54  ;;  %1001 = vmatpush.bf16.msrb.mxu0 %v1879_v8 }
 0x3a8   : > { %1734 = vmatmul.msk.bf16.vlgmr.msra.gmra.mxu3 %vm589_vm3, %v677_v16 }
 0x3a9   : > { %805 = vmatpush.bf16.msrb.mxu3 %v796_v18 }
 0x3ab   : > { %v2006_v21 = vpop.eup %2005  ;;  %1002 = vmatpush.bf16.msrb.mxu0 %v1878_v9 }
 0x3ac   : > { %v788_v22 = vmul.f32 %v2006_v21, %v2000_v4  ;;  %v2008_v23 = vpop.eup %2007  ;;  %v893_v21 = vperm.slane %v2486_v47, 2 }
 0x3ad   : > { %v732_v24 = vmul.f32 %v2008_v23, %v1996_v60  ;;  %v2010_v55 = vpop.eup %2009 }
 0x3ae   : > { %v789_v25 = vpack.c.bf16 %v788_v22, %v788_v22  ;;  %v866_v56 = vmul.f32 32.0, %v2010_v55  ;;  %vm870_vm7 = vweird.f32 %v2010_v55 }
 0x3af   : > { %v733_v28 = vpack.c.bf16 %v732_v24, %v732_v24  ;;  %1003 = vmatpush.bf16.msrb.mxu0 %v1877_v12 }
 0x3b0   : > { %v867_v57 = vsub.f32 1.0, %v866_v56 }
 0x3b2   : > { %v868_v58 = vmul.f32 %v2010_v55, %v867_v57 }
 0x3b3   : > { %1004 = vmatpush.bf16.msrb.mxu0 %v1876_v17 }
 0x3b4   : > { %v869_v59 = vadd.f32 %v2010_v55, %v868_v58  ;;  %v1035_v58 = vperm.slane %v2486_v47, 4 }
 0x3b6   : > { %v2491_v60 = vsel %vm870_vm7, %v2010_v55, %v869_v59 }
 0x3b7   : > { %v735_v26 = vpop.permute.xlu0 %734 }
 0x3b8   : > { %v740_v27 = vsel %vm626_vm5, %v735_v26, 0  ;;  %1738 = vmatmul.msk.bf16.vlgmr.msrb.gmra.mxu3 %vm589_vm3, %v789_v25  ;;  %v1875_v26 = vld [vmem:[#allocation9 + $0x8] sm:$0xff] }
 0x3b9   : > { %749 = vmatpush.bf16.msra.mxu2 %v740_v27  ;;  %1005 = vmatpush.bf16.msrb.mxu0 %v1875_v26  ;;  %v1874_v27 = vld [vmem:[#allocation9] sm:$0xff] }
 0x3bc   : > { %1736 = vmatmul.msk.bf16.vlgmr.msra.gmra.mxu2 %vm589_vm3, %v733_v28  ;;  %v1990_v28 = vld [vmem:[%s2631_s8] ss:$0 sm:$0xff] }
 0x3bd   : > { %925 = vmatpush.bf16.msrb.mxu2 %v1873_v1  ;;  %1006 = vmatpush.bf16.msrb.mxu0 %v1874_v27 }
 0x3c1   : > { %926 = vmatpush.bf16.msrb.mxu2 %v1872_v2 }
 0x42a   : > { %v639_v29 = vpop.f32.mrf.mxu2 }
 0x42b   : > { %v695_v30 = vpop.f32.mrf.mxu3 }
 0x42c   : > { %812 = vrot.lane.b32.xlu2 %v695_v30, %s2265_s15 }
 0x432   : > { %v641_v32 = vpop.f32.mrf.mxu2 }
 0x433   : > { %v697_v33 = vpop.f32.mrf.mxu3 }
 0x43b   : > { %v807_v34 = vpop.f32.mrf.mxu3 }
 0x43c   : > { %820 = vrot.lane.b32.xlu2 %v807_v34, %s2266_s1 }
 0x43f   : > { %v751_v35 = vpop.f32.mrf.mxu2 }
 0x440   : > { %816 = vrot.lane.b32.xlu1 %v751_v35, %s2267_s5  ;;  %v950_v35 = vperm.slane %v2486_v47, 3 }
 0x443   : > { %v809_v36 = vpop.f32.mrf.mxu3 }
 0x447   : > { %v753_v37 = vpop.f32.mrf.mxu2 }
 0x486   : > { %v813_v40 = vpop.permute.xlu2 %812 }
 0x487   : > { %v823_v41 = vsel %vm589_vm3, %v639_v29, %v813_v40 }
 0x496   : > { %v821_v43 = vpop.permute.xlu2 %820 }
 0x4b2   : > { %v817_v42 = vpop.permute.xlu1 %816 }
 0x4b3   : > { %v824_v44 = vsel %vm522_vm0, %v823_v41, %v817_v42 }
 0x4b4   : > { %v826_v45 = vsel %vm825_vm6, %v824_v44, %v821_v43 }
 0x4b5   : > { %v827_v46 = vpack.c.bf16 %v826_v45, %v826_v45 }
 0x4b7   : > { %1747 = vmatmul.msk.bf16.vlgmr.msra.gmra.mxu1 %vm568_vm2, %v827_v46  ;;  %v1883_v46 = vld [vmem:[#allocation4 + $0x18] sm:$0xff] }
 0x4b8   : > { %1068 = vmatpush.bf16.msra.mxu3 %v1883_v46 }
 0x534   : > { %v857_v49 = vpop.f32.mrf.mxu1 }
 0x535   : > { %v858_v50 = vadd.f32 %v857_v49, %v832_v48  ;;  %v1882_v48 = vld [vmem:[#allocation4 + $0x10] sm:$0xff] }
 0x536   : > { %1069 = vmatpush.bf16.msra.mxu3 %v1882_v48 }
 0x537   : > { %v861_v51 = vadd.f32 %v858_v50, %v2419_v13 }
 0x539   : > { %v862_v52 = vsel %vm568_vm2, %v861_v51, 0.0 }
 0x53a   : > { %863 = vadd.xlane.f32.xlu1 %v862_v52 }
 0x53c   : > { %v859_v53 = vpop.f32.mrf.mxu1 }
 0x5ad   : > { %v864_v61 = vpop.xlane.xlu1 %863 }
 0x5ae   : > { %v872_v62 = vmul.f32 %v2491_v60, %v864_v61  ;;  %v1037_v61 = vperm.slane %v2486_v47, 5 }
 0x5b0   : > { %v873_v63 = vsub.f32 %v861_v51, %v872_v62 }
 0x5b2   : > { %v874_v0 = vmul.f32 %v873_v63, %v873_v63 }
 0x5b4   : > { %v875_v13 = vsel %vm568_vm2, %v874_v0, 0.0 }
 0x5b5   : > { %876 = vadd.xlane.f32.xlu0 %v875_v13 }
 0x628   : > { %v877_v4 = vpop.xlane.xlu0 %876 }
 0x629   : > { %v878_v5 = vmul.f32 %v877_v4, %v2491_v60 }
 0x62b   : > { %v879_v7 = vadd.f32 1e-05, %v878_v5 }
 0x62d   : > { %2011 = vrsqrt.f32 %v879_v7  ;;  %vm886_vm9 = vweird.f32 %v879_v7 }
 0x633   : > { %v2012_v10 = vpop.eup %2011 }
 0x634   : > { %v881_v11 = vmul.f32 %v2012_v10, %v879_v7  ;;  %vm887_vm8 = vweird.f32 %v2012_v10 }
 0x635   : > { %vm888_vm10 = vmor %vm886_vm9, %vm887_vm8 }
 0x636   : > { %v882_v14 = vmul.f32 %v2012_v10, %v881_v11 }
 0x638   : > { %v883_v15 = vmul.f32 0.5, %v882_v14 }
 0x63a   : > { %v884_v18 = vsub.f32 1.5, %v883_v15 }
 0x63c   : > { %v885_v19 = vmul.f32 %v2012_v10, %v884_v18 }
 0x63e   : > { %v889_v16 = vsel %vm888_vm10, %v2012_v10, %v885_v19 }
 0x63f   : > { %v890_v22 = vmul.f32 %v889_v16, %v873_v63 }
 0x641   : > { %v892_v23 = vmul.f32 %v891_v20, %v890_v22 }
 0x643   : > { %v894_v24 = vadd.f32 %v893_v21, %v892_v23 }
 0x645   : > { %v895_v25 = vpack.c.bf16 %v894_v24, %v894_v24 }
 0x647   : > { %1756 = vmatmul.msk.bf16.vlgmr.msrb.gmra.mxu2 %vm568_vm2, %v895_v25 }
 0x6ca   : > { %v928_v29 = vpop.f32.mrf.mxu2 }
 0x6cb   : > { %v929_v30 = vadd.f32 %v1990_v28, %v928_v29 }
 0x6cd   : > { %v932_v32 = vmax.f32 %v929_v30, 0.0 }
 0x6cf   : > { %v933_v33 = vpack.c.bf16 %v932_v32, %v932_v32 }
 0x6d1   : > { %1007 = vmatmul.bf16.vlgmr.msrb.gmra.mxu0 %v933_v33 }
 0x6d2   : > { %v930_v34 = vpop.f32.mrf.mxu2 }
 0x74e   : > { %v1008_v36 = vpop.f32.mrf.mxu0 }
 0x74f   : > { %v1009_v37 = vadd.f32 %v1008_v36, %v950_v35 }
 0x751   : > { %v1012_v38 = vadd.f32 %v1009_v37, %v894_v24 }
 0x753   : > { %v1013_v39 = vsel %vm568_vm2, %v1012_v38, 0.0 }
 0x754   : > { %1014 = vadd.xlane.f32.xlu2 %v1013_v39 }
 0x756   : > { %v1010_v40 = vpop.f32.mrf.mxu0 }
 0x7c7   : > { %v1015_v41 = vpop.xlane.xlu2 %1014 }
 0x7c8   : > { %v1016_v42 = vmul.f32 %v1015_v41, %v2491_v60 }
 0x7ca   : > { %v1017_v43 = vsub.f32 %v1012_v38, %v1016_v42 }
 0x7cc   : > { %v1018_v44 = vmul.f32 %v1017_v43, %v1017_v43 }
 0x7ce   : > { %v1019_v45 = vsel %vm568_vm2, %v1018_v44, 0.0 }
 0x7cf   : > { %1020 = vadd.xlane.f32.xlu1 %v1019_v45 }
 0x842   : > { %v1021_v49 = vpop.xlane.xlu1 %1020 }
 0x843   : > { %v1022_v50 = vmul.f32 %v1021_v49, %v2491_v60 }
 0x845   : > { %v1023_v51 = vadd.f32 1e-05, %v1022_v50 }
 0x847   : > { %2013 = vrsqrt.f32 %v1023_v51  ;;  %vm1030_vm12 = vweird.f32 %v1023_v51 }
 0x84d   : > { %v2014_v52 = vpop.eup %2013 }
 0x84e   : > { %v1025_v53 = vmul.f32 %v2014_v52, %v1023_v51  ;;  %vm1031_vm11 = vweird.f32 %v2014_v52 }
 0x84f   : > { %vm1032_vm13 = vmor %vm1030_vm12, %vm1031_vm11 }
 0x850   : > { %v1026_v54 = vmul.f32 %v2014_v52, %v1025_v53 }
 0x852   : > { %v1027_v55 = vmul.f32 0.5, %v1026_v54 }
 0x854   : > { %v1028_v56 = vsub.f32 1.5, %v1027_v55 }
 0x856   : > { %v1029_v57 = vmul.f32 %v2014_v52, %v1028_v56 }
 0x858   : > { %v1033_v59 = vsel %vm1032_vm13, %v2014_v52, %v1029_v57 }
 0x859   : > { %v1034_v62 = vmul.f32 %v1033_v59, %v1017_v43 }
 0x85b   : > { %v1036_v63 = vmul.f32 %v1035_v58, %v1034_v62 }
 0x85d   : > { %v2509_v0 = vadd.f32 %v1037_v61, %v1036_v63 }
 0x85f   : > { %v1041_v13 = vpack.c.bf16 %v2509_v0, %v2509_v0 }
 0x861   : > { %1797 = vmatmul.msk.bf16.vlgmr.msra.gmra.mxu3 %vm568_vm2, %v1041_v13 }
 0x8e4   : > { %v1071_v1 = vpop.f32.mrf.mxu3 }
 0x8e5   : > { %v2514_v2 = vpack.c.bf16 %v1071_v1, %v1071_v1 }
 0x8e7   : > { %1110 = vrot.lane.b32.xlu1 %v2514_v2, %s2261_s16  ;;  %1077 = vrot.lane.b32.xlu0 %v2514_v2, %s2255_s17 }
 0x8ec   : > { %v1073_v3 = vpop.f32.mrf.mxu3 }
 0x8ef   : > { %1131 = vrot.lane.b32.xlu0 %v2514_v2, %s2257_s24 }
 0x8f7   : > { %1189 = vrot.lane.b32.xlu0 %v2514_v2, %s2253_s29 }
 0x8ff   : > { %1187 = vrot.lane.b32.xlu0 %v2514_v2, %s2258_s28 }
 0x959   : > { %v1111_v47 = vpop.permute.xlu1 %1110  ;;  %v1078_v4 = vpop.permute.xlu0 %1077 }
 0x95a   : > { %v1116_v5 = vsel %vm626_vm5, %v1111_v47, 0  ;;  %v1083_v6 = vsel %vm589_vm3, %v1078_v4, 0 }
 0x95b   : > { %1092 = vmatpush.bf16.xpose.msrb.mxu1 %v1083_v6  ;;  %1125 = vmatpush.bf16.msra.mxu2 %v1116_v5 }
 0x961   : > { %v1132_v7 = vpop.permute.xlu0 %1131 }
 0x962   : > { %1798 = vmatmul.msk.bf16.vlgmr.msrb.gmra.mxu1 %vm589_vm3, %v2514_v2 }
 0x969   : > { %v1190_v8 = vpop.permute.xlu0 %1189 }
 0x96a   : > { %v1195_v9 = vsel %vm589_vm3, %v1190_v8, 0 }
 0x96b   : > { %1204 = vmatpush.bf16.xpose.msrb.mxu2 %v1195_v9 }
 0x971   : > { %v1188_v33 = vpop.permute.xlu0 %1187 }
 0x9df   : > { %v1094_v10 = vpop.f32.mrf.mxu1 }
 0x9e0   : > { %v1095_v11 = vadd.f32 %v1094_v10, %v2449_v31 }
 0x9e2   : > { %v1098_v12 = vsel %vm589_vm3, %v1095_v11, -inf }
 0x9e3   : > { %1099 = vmax.xlane.f32.xlu2 %v1098_v12 }
 0x9e7   : > { %v1096_v14 = vpop.f32.mrf.mxu1 }
 0x9fb   : > { %1133 = vrot.lane.b32.xlu2 %v2514_v2, %s2254_s30 }
 0xa03   : > { %1245 = vrot.lane.b32.xlu2 %v2514_v2, %s2256_s18 }
 0xa56   : > { %v1100_v15 = vpop.xlane.xlu2 %1099 }
 0xa57   : > { %v1101_v17 = vsub.f32 %v1095_v11, %v1100_v15 }
 0xa59   : > { %v1102_v18 = vmul.f32 1.442695, %v1101_v17 }
 0xa5b   : > { %2015 = vpow2.f32 %v1102_v18 }
 0xa5e   : > { %v1134_v19 = vpop.permute.xlu2 %1133 }
 0xa5f   : > { %v1139_v20 = vsel %vm589_vm3, %v1134_v19, 0 }
 0xa60   : > { %1148 = vmatpush.bf16.xpose.msrb.mxu3 %v1139_v20 }
 0xa61   : > { %v2016_v16 = vpop.eup %2015 }
 0xa62   : > { %v1104_v21 = vsel %vm589_vm3, %v2016_v16, 0.0 }
 0xa63   : > { %1105 = vadd.xlane.f32.xlu1 %v1104_v21  ;;  %v1885_v21 = vld [vmem:[#allocation6 + $0x18] sm:$0xff] }
 0xa66   : > { %v1246_v22 = vpop.permute.xlu2 %1245 }
 0xa67   : > { %v1251_v23 = vsel %vm589_vm3, %v1246_v22, 0  ;;  %1800 = vmatmul.msk.bf16.vlgmr.msrb.gmra.mxu3 %vm589_vm3, %v1132_v7  ;;  %v1884_v22 = vld [vmem:[#allocation6 + $0x10] sm:$0xff] }
 0xa68   : > { %1260 = vmatpush.bf16.xpose.msra.mxu3 %v1251_v23 }
 0xa7c   : > { %1243 = vrot.lane.b32.xlu1 %v2514_v2, %s2259_s13 }
 0xad6   : > { %v1106_v24 = vpop.xlane.xlu1 %1105 }
 0xad7   : > { %2017 = vrcp.f32 %v1106_v24 }
 0xadd   : > { %v2018_v25 = vpop.eup %2017 }
 0xade   : > { %v1108_v26 = vmul.f32 %v2018_v25, %v2016_v16 }
 0xae0   : > { %v1109_v27 = vpack.c.bf16 %v1108_v26, %v1108_v26 }
 0xae2   : > { %1799 = vmatmul.msk.bf16.vlgmr.msra.gmra.mxu2 %vm589_vm3, %v1109_v27 }
 0xae3   : > { %1342 = vmatpush.bf16.msra.mxu2 %v1885_v21 }
 0xae7   : > { %1343 = vmatpush.bf16.msra.mxu2 %v1884_v22 }
 0xaea   : > { %v1150_v28 = vpop.f32.mrf.mxu3 }
 0xaeb   : > { %v1151_v29 = vadd.f32 %v1150_v28, %v2449_v31 }
 0xaed   : > { %v1154_v30 = vsel %vm589_vm3, %v1151_v29, -inf }
 0xaee   : > { %v1244_v32 = vpop.permute.xlu1 %1243  ;;  %1155 = vmax.xlane.f32.xlu2 %v1154_v30  ;;  %v2577_v30 = vld [vmem:[#allocation10 + $0x8] sm:$0x3f] }
 0xaef   : > { %1804 = vmatmul.msk.bf16.vlgmr.msra.gmra.mxu3 %vm589_vm3, %v1244_v32  ;;  %v1320_v32 = vperm.slane %v2577_v30, 0 }
 0xaf2   : > { %v1152_v34 = vpop.f32.mrf.mxu3  ;;  %1802 = vmatmul.msk.bf16.vlgmr.msrb.gmra.mxu2 %vm589_vm3, %v1188_v33 }
 0xb61   : > { %v1156_v35 = vpop.xlane.xlu2 %1155 }
 0xb62   : > { %v1157_v36 = vsub.f32 %v1151_v29, %v1156_v35 }
 0xb64   : > { %v1158_v37 = vmul.f32 1.442695, %v1157_v36 }
 0xb65   : > { %v2548_v38 = vpop.f32.mrf.mxu2 }
 0xb66   : > { %2019 = vpow2.f32 %v1158_v37 }
 0xb6c   : > { %v2020_v39 = vpop.eup %2019 }
 0xb6d   : > { %v1129_v40 = vpop.f32.mrf.mxu2  ;;  %v1160_v41 = vsel %vm589_vm3, %v2020_v39, 0.0 }
 0xb6e   : > { %1161 = vadd.xlane.f32.xlu2 %v1160_v41 }
 0xb72   : > { %v1262_v42 = vpop.f32.mrf.mxu3 }
 0xb73   : > { %v1263_v43 = vadd.f32 %v1262_v42, %v2449_v31 }
 0xb75   : > { %v1206_v44 = vpop.f32.mrf.mxu2  ;;  %v1266_v45 = vsel %vm589_vm3, %v1263_v43, -inf }
 0xb76   : > { %v1207_v46 = vadd.f32 %v1206_v44, %v2449_v31  ;;  %1267 = vmax.xlane.f32.xlu1 %v1266_v45  ;;  %v1886_v44 = vld [vmem:[#allocation7 + $0x10] sm:$0xff]  ;;  %v1895_v45 = vld [vmem:[#allocation9 + $0x78] sm:$0xff] }
 0xb77   : > { %1483 = vmatpush.bf16.msrb.mxu3 %v1895_v45  ;;  %v1897_v45 = vld [vmem:[%s2633_s10 + $0x8] sm:$0xff] }
 0xb78   : > { %v1210_v48 = vsel %vm589_vm3, %v1207_v46, -inf }
 0xb79   : > { %1211 = vmax.xlane.f32.xlu0 %v1210_v48  ;;  %v1894_v48 = vld [vmem:[#allocation9 + $0x70] sm:$0xff] }
 0xb7a   : > { %v1264_v49 = vpop.f32.mrf.mxu3 }
 0xb7b   : > { %1484 = vmatpush.bf16.msrb.mxu3 %v1894_v48 }
 0xb7d   : > { %v1208_v50 = vpop.f32.mrf.mxu2 }
 0xb7e   : > { %v1893_v50 = vld [vmem:[#allocation9 + $0x68] sm:$0xff] }
 0xb7f   : > { %1485 = vmatpush.bf16.msrb.mxu3 %v1893_v50 }
 0xb8d   : > { %1166 = vrot.lane.b32.xlu0 %v2514_v2, %s2263_s19 }
 0xbe1   : > { %v1162_v57 = vpop.xlane.xlu2 %1161 }
 0xbe9   : > { %v1268_v51 = vpop.xlane.xlu1 %1267 }
 0xbea   : > { %v1269_v52 = vsub.f32 %v1263_v43, %v1268_v51  ;;  %v1887_v43 = vld [vmem:[#allocation7 + $0x18] sm:$0xff]  ;;  %v1892_v51 = vld [vmem:[#allocation9 + $0x60] sm:$0xff] }
 0xbeb   : > { %1486 = vmatpush.bf16.msrb.mxu3 %v1892_v51 }
 0xbec   : > { %v1270_v53 = vmul.f32 1.442695, %v1269_v52  ;;  %v1212_v54 = vpop.xlane.xlu0 %1211 }
 0xbed   : > { %v1213_v55 = vsub.f32 %v1207_v46, %v1212_v54  ;;  %v1891_v54 = vld [vmem:[#allocation9 + $0x58] sm:$0xff] }
 0xbee   : > { %2021 = vpow2.f32 %v1270_v53 }
 0xbef   : > { %v1214_v56 = vmul.f32 1.442695, %v1213_v55  ;;  %1487 = vmatpush.bf16.msrb.mxu3 %v1891_v54 }
 0xbf1   : > { %2023 = vpow2.f32 %v1214_v56 }
 0xbf2   : > { %2025 = vrcp.f32 %v1162_v57  ;;  %v1890_v57 = vld [vmem:[#allocation9 + $0x50] sm:$0xff] }
 0xbf3   : > { %1488 = vmatpush.bf16.msrb.mxu3 %v1890_v57 }
 0xbf4   : > { %v2022_v58 = vpop.eup %2021 }
 0xbf5   : > { %v1272_v31 = vsel %vm589_vm3, %v2022_v58, 0.0 }
 0xbf6   : > { %1273 = vadd.xlane.f32.xlu2 %v1272_v31 }
 0xbf7   : > { %v2024_v59 = vpop.eup %2023 }
 0xbf8   : > { %v1216_v61 = vsel %vm589_vm3, %v2024_v59, 0.0  ;;  %v2026_v62 = vpop.eup %2025 }
 0xbf9   : > { %1217 = vadd.xlane.f32.xlu1 %v1216_v61  ;;  %v1164_v63 = vmul.f32 %v2026_v62, %v2020_v39  ;;  %v1374_v62 = vperm.slane %v2577_v30, 2 }
 0xbfb   : > { %v1165_v3 = vpack.c.bf16 %v1164_v63, %v1164_v63 }
 0xbff   : > { %v1167_v13 = vpop.permute.xlu0 %1166 }
 0xc00   : > { %v1172_v1 = vsel %vm626_vm5, %v1167_v13, 0 }
 0xc01   : > { %1181 = vmatpush.bf16.msra.mxu1 %v1172_v1 }
 0xc04   : > { %1801 = vmatmul.msk.bf16.vlgmr.msra.gmra.mxu1 %vm589_vm3, %v1165_v3 }
 0xc0e   : > { %1278 = vrot.lane.b32.xlu2 %v2514_v2, %s2262_s23 }
 0xc12   : > { %1222 = vrot.lane.b32.xlu1 %v2514_v2, %s2264_s27  ;;  %s508_s27 = scalar_lea.vmem %s2635_s12, %s1718_s3 }
 0xc69   : > { %v1274_v47 = vpop.xlane.xlu2 %1273 }
 0xc6a   : > { %2027 = vrcp.f32 %v1274_v47  ;;  %v1889_v47 = vld [vmem:[#allocation9 + $0x48] sm:$0xff] }
 0xc6b   : > { %1489 = vmatpush.bf16.msrb.mxu3 %v1889_v47 }
 0xc6c   : > { %v1218_v9 = vpop.xlane.xlu1 %1217 }
 0xc6d   : > { %2029 = vrcp.f32 %v1218_v9 }
 0xc70   : > { %v2028_v4 = vpop.eup %2027 }
 0xc71   : > { %v1276_v5 = vmul.f32 %v2028_v4, %v2022_v58  ;;  %v1279_v6 = vpop.permute.xlu2 %1278  ;;  %v1888_v4 = vld [vmem:[#allocation9 + $0x40] sm:$0xff] }
 0xc72   : > { %v1284_v7 = vsel %vm626_vm5, %v1279_v6, 0  ;;  %1490 = vmatpush.bf16.msrb.mxu3 %v1888_v4 }
 0xc73   : > { %v1277_v8 = vpack.c.bf16 %v1276_v5, %v1276_v5  ;;  %1293 = vmatpush.bf16.msrb.mxu1 %v1284_v7  ;;  %v2030_v10 = vpop.eup %2029  ;;  %v1991_v5 = vld [vmem:[%s2631_s8 + $0x1] ss:$0 sm:$0xff] }
 0xc74   : > { %v1220_v12 = vmul.f32 %v2030_v10, %v2024_v59  ;;  %v1372_v59 = vperm.slane %v2577_v30, 1 }
 0xc76   : > { %1805 = vmatmul.msk.bf16.vlgmr.msrb.gmra.mxu1 %vm589_vm3, %v1277_v8  ;;  %v1221_v15 = vpack.c.bf16 %v1220_v12, %v1220_v12 }
 0xc77   : > { %1580 = vmatpush.bf16.msra.mxu1 %v1897_v45 }
 0xc81   : > { %v1183_v11 = vpop.f32.mrf.mxu1 }
 0xc82   : > { %1300 = vrot.lane.b32.xlu0 %v1183_v11, %s2265_s15  ;;  %v1434_v11 = vperm.slane %v2577_v30, 3 }
 0xc84   : > { %v1223_v14 = vpop.permute.xlu1 %1222 }
 0xc85   : > { %v1228_v2 = vsel %vm626_vm5, %v1223_v14, 0 }
 0xc86   : > { %1237 = vmatpush.bf16.msra.mxu0 %v1228_v2 }
 0xc89   : > { %v1185_v17 = vpop.f32.mrf.mxu1  ;;  %1803 = vmatmul.msk.bf16.vlgmr.msra.gmra.mxu0 %vm589_vm3, %v1221_v15 }
 0xc8a   : > { %1408 = vmatpush.bf16.msrb.mxu0 %v1887_v43 }
 0xc8e   : > { %1409 = vmatpush.bf16.msrb.mxu0 %v1886_v44 }
 0xcf3   : > { %v1295_v18 = vpop.f32.mrf.mxu1 }
 0xcf4   : > { %1308 = vrot.lane.b32.xlu1 %v1295_v18, %s2266_s1  ;;  %v1301_v23 = vpop.permute.xlu0 %1300 }
 0xcf5   : > { %v1311_v24 = vsel %vm589_vm3, %v2548_v38, %v1301_v23 }
 0xcfb   : > { %v1297_v19 = vpop.f32.mrf.mxu1 }
 0xd06   : > { %v1239_v20 = vpop.f32.mrf.mxu0 }
 0xd07   : > { %1304 = vrot.lane.b32.xlu0 %v1239_v20, %s2267_s5 }
 0xd0e   : > { %v1241_v16 = vpop.f32.mrf.mxu0 }
 0xd66   : > { %v1309_v26 = vpop.permute.xlu1 %1308 }
 0xd79   : > { %v1305_v25 = vpop.permute.xlu0 %1304 }
 0xd7a   : > { %v1312_v27 = vsel %vm522_vm0, %v1311_v24, %v1305_v25 }
 0xd7b   : > { %v1313_v28 = vsel %vm825_vm6, %v1312_v27, %v1309_v26 }
 0xd7c   : > { %v1314_v29 = vpack.c.bf16 %v1313_v28, %v1313_v28 }
 0xd7e   : > { %1814 = vmatmul.msk.bf16.vlgmr.msra.gmra.mxu2 %vm568_vm2, %v1314_v29 }
 0xe01   : > { %v1345_v33 = vpop.f32.mrf.mxu2 }
 0xe02   : > { %v1346_v34 = vadd.f32 %v1345_v33, %v1320_v32  ;;  %v1519_v33 = vperm.slane %v2577_v30, 4 }
 0xe04   : > { %v1349_v35 = vadd.f32 %v1346_v34, %v2509_v0 }
 0xe06   : > { %v1350_v36 = vsel %vm568_vm2, %v1349_v35, 0.0 }
 0xe07   : > { %1351 = vadd.xlane.f32.xlu0 %v1350_v36  ;;  %v1521_v36 = vperm.slane %v2577_v30, 5  ;;  %v1896_v30 = vld [vmem:[%s2633_s10] sm:$0xff] }
 0xe08   : > { %1581 = vmatpush.bf16.msra.mxu1 %v1896_v30 }
 0xe09   : > { %v1347_v37 = vpop.f32.mrf.mxu2 }
 0xe7a   : > { %v1352_v38 = vpop.xlane.xlu0 %1351 }
 0xe7b   : > { %v1353_v39 = vmul.f32 %v1352_v38, %v2491_v60 }
 0xe7d   : > { %v1354_v40 = vsub.f32 %v1349_v35, %v1353_v39 }
 0xe7f   : > { %v1355_v41 = vmul.f32 %v1354_v40, %v1354_v40 }
 0xe81   : > { %v1356_v42 = vsel %vm568_vm2, %v1355_v41, 0.0 }
 0xe82   : > { %1357 = vadd.xlane.f32.xlu2 %v1356_v42 }
 0xef5   : > { %v1358_v46 = vpop.xlane.xlu2 %1357 }
 0xef6   : > { %v1359_v0 = vmul.f32 %v1358_v46, %v2491_v60 }
 0xef8   : > { %v1360_v49 = vadd.f32 1e-05, %v1359_v0 }
 0xefa   : > { %2031 = vrsqrt.f32 %v1360_v49  ;;  %vm1367_vm15 = vweird.f32 %v1360_v49 }
 0xf00   : > { %v2032_v52 = vpop.eup %2031 }
 0xf01   : > { %v1362_v53 = vmul.f32 %v2032_v52, %v1360_v49  ;;  %vm1368_vm14 = vweird.f32 %v2032_v52 }
 0xf02   : > { %vm1369_vm0 = vmor %vm1367_vm15, %vm1368_vm14 }
 0xf03   : > { %v1363_v55 = vmul.f32 %v2032_v52, %v1362_v53  ;;  %v1523_v53 = vld [vmem:[%s2632_s9] sm:$0x3] }
 0xf05   : > { %v1364_v56 = vmul.f32 0.5, %v1363_v55 }
 0xf07   : > { %v1365_v58 = vsub.f32 1.5, %v1364_v56  ;;  %v1546_v56 = vperm.slane %v1523_v53, 0 }
 0xf09   : > { %v1366_v31 = vmul.f32 %v2032_v52, %v1365_v58 }
 0xf0b   : > { %v1370_v61 = vsel %vm1369_vm0, %v2032_v52, %v1366_v31 }
 0xf0c   : > { %v1371_v63 = vmul.f32 %v1370_v61, %v1354_v40 }
 0xf0e   : > { %v1373_v13 = vmul.f32 %v1372_v59, %v1371_v63 }
 0xf10   : > { %v1375_v1 = vadd.f32 %v1374_v62, %v1373_v13  ;;  %v1992_v62 = vld [vmem:[%s2634_s11] ss:$0 sm:$0xff] }
 0xf12   : > { %v1376_v3 = vpack.c.bf16 %v1375_v1, %v1375_v1 }
 0xf14   : > { %1824 = vmatmul.msk.bf16.vlgmr.msrb.gmra.mxu0 %vm568_vm2, %v1376_v3 }
 0xf91   : > { %v1411_v6 = vpop.f32.mrf.mxu0 }
 0xf92   : > { %v1412_v7 = vadd.f32 %v1991_v5, %v1411_v6 }
 0xf94   : > { %v1415_v8 = vmax.f32 %v1412_v7, 0.0 }
 0xf96   : > { %v1416_v9 = vpack.c.bf16 %v1415_v8, %v1415_v8 }
 0xf98   : > { %1491 = vmatmul.bf16.vlgmr.msrb.gmra.mxu3 %v1416_v9 }
 0xf99   : > { %v1413_v10 = vpop.f32.mrf.mxu0 }
0x101b   : > { %v1492_v12 = vpop.f32.mrf.mxu3 }
0x101c   : > { %v1493_v14 = vadd.f32 %v1492_v12, %v1434_v11 }
0x101e   : > { %v1496_v2 = vadd.f32 %v1493_v14, %v1375_v1 }
0x1020   : > { %v1497_v15 = vsel %vm568_vm2, %v1496_v2, 0.0 }
0x1021   : > { %1498 = vadd.xlane.f32.xlu1 %v1497_v15 }
0x1023   : > { %v1494_v17 = vpop.f32.mrf.mxu3 }
0x1094   : > { %v1499_v18 = vpop.xlane.xlu1 %1498 }
0x1095   : > { %v1500_v19 = vmul.f32 %v1499_v18, %v2491_v60 }
0x1097   : > { %v1501_v20 = vsub.f32 %v1496_v2, %v1500_v19 }
0x1099   : > { %v1502_v16 = vmul.f32 %v1501_v20, %v1501_v20 }
0x109b   : > { %v1503_v21 = vsel %vm568_vm2, %v1502_v16, 0.0 }
0x109c   : > { %1504 = vadd.xlane.f32.xlu0 %v1503_v21 }
0x110f   : > { %v1505_v22 = vpop.xlane.xlu0 %1504 }
0x1110   : > { %v1506_v23 = vmul.f32 %v1505_v22, %v2491_v60 }
0x1112   : > { %v1507_v24 = vadd.f32 1e-05, %v1506_v23 }
0x1114   : > { %2033 = vrsqrt.f32 %v1507_v24  ;;  %vm1514_vm3 = vweird.f32 %v1507_v24 }
0x111a   : > { %v2034_v25 = vpop.eup %2033 }
0x111b   : > { %v1509_v26 = vmul.f32 %v2034_v25, %v1507_v24  ;;  %vm1515_vm1 = vweird.f32 %v2034_v25 }
0x111c   : > { %vm1516_vm4 = vmor %vm1514_vm3, %vm1515_vm1 }
0x111d   : > { %v1510_v27 = vmul.f32 %v2034_v25, %v1509_v26 }
0x111f   : > { %v1511_v28 = vmul.f32 0.5, %v1510_v27 }
0x1121   : > { %v1512_v29 = vsub.f32 1.5, %v1511_v28 }
0x1123   : > { %v1513_v32 = vmul.f32 %v2034_v25, %v1512_v29 }
0x1125   : > { %v1517_v34 = vsel %vm1516_vm4, %v2034_v25, %v1513_v32 }
0x1126   : > { %v1518_v35 = vmul.f32 %v1517_v34, %v1501_v20 }
0x1128   : > { %v1520_v37 = vmul.f32 %v1519_v33, %v1518_v35 }
0x112a   : > { %v1522_v38 = vadd.f32 %v1521_v36, %v1520_v37 }
0x112c   : > { %v1524_v39 = vsel %vm568_vm2, %v1522_v38, 0.0 }
0x112d   : > { %1525 = vadd.xlane.f32.xlu2 %v1524_v39 }
0x11a0   : > { %v1526_v40 = vpop.xlane.xlu2 %1525 }
0x11a1   : > { %v1527_v41 = vmul.f32 %v1526_v40, %v2491_v60 }
0x11a3   : > { %v1528_v42 = vsub.f32 %v1522_v38, %v1527_v41 }
0x11a5   : > { %v1529_v43 = vmul.f32 %v1528_v42, %v1528_v42 }
0x11a7   : > { %v1530_v44 = vsel %vm568_vm2, %v1529_v43, 0.0 }
0x11a8   : > { %1531 = vadd.xlane.f32.xlu1 %v1530_v44 }
0x121b   : > { %v1532_v46 = vpop.xlane.xlu1 %1531 }
0x121c   : > { %v1533_v0 = vmul.f32 %v1532_v46, %v2491_v60  ;;  %v1548_v60 = vperm.slane %v1523_v53, 1 }
0x121e   : > { %v1534_v48 = vadd.f32 1e-05, %v1533_v0 }
0x1220   : > { %2035 = vrsqrt.f32 %v1534_v48  ;;  %vm1541_vm6 = vweird.f32 %v1534_v48 }
0x1226   : > { %v2036_v49 = vpop.eup %2035 }
0x1227   : > { %v1536_v50 = vmul.f32 %v2036_v49, %v1534_v48  ;;  %vm1542_vm5 = vweird.f32 %v2036_v49 }
0x1228   : > { %vm1543_vm7 = vmor %vm1541_vm6, %vm1542_vm5 }
0x1229   : > { %v1537_v51 = vmul.f32 %v2036_v49, %v1536_v50 }
0x122b   : > { %v1538_v52 = vmul.f32 0.5, %v1537_v51 }
0x122d   : > { %v1539_v54 = vsub.f32 1.5, %v1538_v52 }
0x122f   : > { %v1540_v55 = vmul.f32 %v2036_v49, %v1539_v54 }
0x1231   : > { %v1544_v57 = vsel %vm1543_vm7, %v2036_v49, %v1540_v55 }
0x1232   : > { %v1545_v58 = vmul.f32 %v1544_v57, %v1528_v42 }
0x1234   : > { %v1547_v31 = vmul.f32 %v1546_v56, %v1545_v58 }
0x1236   : > { %v1549_v59 = vadd.f32 %v1548_v60, %v1547_v31 }
0x1238   : > { %v1550_v61 = vpack.c.bf16 %v1549_v59, %v1549_v59 }
0x123a   : > { %1865 = vmatmul.msk.bf16.vlgmr.msra.gmra.mxu1 %vm568_vm2, %v1550_v61 }
0x12b7   : > { %v1583_v63 = vpop.f32.mrf.mxu1 }
0x12b8   : > { %v1584_v13 = vadd.f32 %v1992_v62, %v1583_v63 }
0x12ba   : > { %1587 = vst [vmem:[%s508_s27] sm:$0xff] %v1584_v13 }
0x12bf   : > { %v1585_v1 = vpop.f32.mrf.mxu1 }
0x12c0 PF: > { %s26_s21 = sadd.s32 1, %s2239_s21  }
0x12c1   : > { %p23_p7 = scmp.ge.s32.totalorder %s26_s21, 4  }
0x12c3   :  { %25 = sbr.rel (!%p23_p7) target bundleno = 8 (0x8), region = 129 }
0x12c8   :  { %1607 = vsyncpa [#allocation3], 1 }
0x12c9   :  { %1609 = vsyncpa [#allocation3 + $0x1], 1 }
0x12ca   :  { %1610 = vsyncpa [#allocation5], 1 }
0x12cb   :  { %1611 = vsyncpa [#allocation8], 1 }
0x12cc   :  { %1612 = vsyncpa [#allocation11], 1 }

</bundles_post_ra>
